<compile_context>
chip_gen: v7x
topology: tpu7x:2x2x1
jax: 0.10.0
libtpu: 0.0.40
codegen_flags: <defaults>
</compile_context>

<pallas_src>
import jax
import jax.numpy as jnp
from jax.experimental import pallas as pl
from jax.experimental.pallas import tpu as pltpu

NUM_LAYERS = 11


def _elu(x):
    # ELU(alpha=1): x if x > 0 else exp(x) - 1
    return jnp.where(x > 0, x, jnp.exp(jnp.minimum(x, 0.0)) - 1.0)


# --------------------------- fused whole-model kernel ---------------------------
def _make_fused_kernel(C, H1, G1, G2, L1P):
    L1 = H1 * G1          # pooled-1 spatial (h-major rows of width G1)
    L2W = L1              # "wide" conv2 output columns (h*G1 + w2)
    LM2 = L2W - 2
    NSEL = G2 * H1        # pooled-2 columns, ordered g2*H1 + h
    XW = (H1 + 2) * G1 + 2  # H-padded wide scratch width

    def kernel(v_ref, w1_ref, b1_ref, w2s_ref, b2_ref, sel_ref, w3_ref, b3_ref,
               wc_ref, bc_ref, dw_ref, db_ref, out_ref, x2_ref):
        # ---- Stage 1: conv1 + bias + ELU + MaxPool(1,3).
        # The wrapper phase-split/im2col'd the raw input into three 512-lane
        # slots -> ONE MXU matmul, then a max over lane-aligned slices.
        # (per-channel bias and the monotonic ELU commute with the max.)
        c1 = jnp.dot(w1_ref[...], v_ref[0],
                     preferred_element_type=jnp.float32)        # (C, 3*L1P)
        m1 = jnp.maximum(jnp.maximum(c1[:, 0:L1P], c1[:, L1P:2 * L1P]),
                         c1[:, 2 * L1P:3 * L1P])                # (C, L1P)
        pool1 = _elu(m1[:, :L1] + b1_ref[...])                  # (C, L1)

        # ---- Stage 2: conv2 + bias + ELU + MaxPool(1,3).
        # H-pad pool1 into the wide scratch.  Only the two pad regions are
        # zeroed (every step: cheap, and correct even when the parallel grid
        # axis is sharded across TensorCores with per-core scratch).
        x2_ref[:, 0:G1] = jnp.zeros((C, G1), jnp.float32)
        x2_ref[:, G1 + L1:XW] = jnp.zeros((C, XW - G1 - L1), jnp.float32)
        x2_ref[:, G1:G1 + L1] = pool1

        # conv2 as nine accumulated (16,16)@(16,L2W) matmuls on shifted views
        # (no im2col slab, no slab scratch).
        c2 = jnp.zeros((C, L2W), jnp.float32)
        t = 0
        for i in range(3):
            for j in range(3):
                off = i * G1 + j
                c2 = c2 + jnp.dot(w2s_ref[t], x2_ref[:, off:off + L2W],
                                  preferred_element_type=jnp.float32)
                t += 1

        # Pool over width: max of 3 shifted column sets, then one 0/1 selection
        # matmul (precomputed, VMEM-resident) that downsamples by 3, drops
        # per-row wrap garbage and reorders columns to q = g2*H1 + h.
        m2 = jnp.maximum(jnp.maximum(c2[:, 0:LM2], c2[:, 1:LM2 + 1]),
                         c2[:, 2:LM2 + 2])                      # (C, LM2)
        p2 = jnp.dot(m2, sel_ref[...],
                     preferred_element_type=jnp.float32)        # (C, NSEL)
        p2 = _elu(p2 + b2_ref[...])

        # ---- Stage 3: conv3 (1x8 over the pooled width) + bias + ELU.
        acc3 = jnp.zeros((C, H1), jnp.float32) + b3_ref[...]
        for g2 in range(G2):
            acc3 = acc3 + jnp.dot(w3_ref[g2], p2[:, g2 * H1:(g2 + 1) * H1],
                                  preferred_element_type=jnp.float32)
        y = _elu(acc3)                                          # (C, H1) features

        # ---- TCN: only network[-1] (dilation 2**10) reaches the output, and
        # with L = H1 <= dilation only its centre tap overlaps real data.
        yb = _elu(jnp.dot(wc_ref[...], y, preferred_element_type=jnp.float32)
                  + bc_ref[...])

        # ---- Dense(16 -> 1) over time: VPU multiply + cross-sublane reduce.
        out_ref[0] = (jnp.sum(dw_ref[...] * yb, axis=0, keepdims=True)
                      + db_ref[...])

    return kernel


# ------------------------------------ Model -------------------------------------
def tcn_model_forward(x, p):
    n, cin, h, w = x.shape
    assert cin == 1
    C = 16
    H1 = h                        # conv1/conv2 keep H (pad_h=1, k=3)
    G1 = (w - 2) // 3             # width after conv1 + pool1
    G2 = (G1 - 2) // 3            # width after conv2 + pool2
    assert G2 == 8, "conv3 kernel (1, 8) must collapse the width to 1"
    assert H1 <= 1024, "centre-tap shortcut of the dilation-1024 conv needs L <= 1024"
    L1 = H1 * G1
    L1P = ((L1 + 127) // 128) * 128   # 512-lane phase slot (lane-aligned max slices)
    LM2 = L1 - 2
    NSEL = G2 * H1
    XW = (H1 + 2) * G1 + 2

    # Wrapper prep on the tiny raw input only: H-pad + phase-split im2col laid
    # out as three lane-aligned L1P-wide slots so the fused kernel does
    # conv1+pool1 with a single matmul and no unaligned lane shifts.
    xp = jnp.pad(x[:, 0], ((0, 0), (1, 1), (0, 0)))            # (N, H+2, W)
    phases = []
    for r in range(3):                                         # pooling phase
        taps = []
        for i in range(3):                                     # kh tap
            for j in range(3):                                 # kw tap
                s = r + j
                sl = xp[:, i:i + H1, s:s + 3 * (G1 - 1) + 1:3]  # (N, H1, G1)
                taps.append(sl.reshape(n, L1))
        ph = jnp.stack(taps, axis=1)                            # (N, 9, L1)
        ph = jnp.pad(ph, ((0, 0), (0, 16 - 9), (0, L1P - L1)))  # (N, 16, L1P)
        phases.append(ph)
    v = jnp.concatenate(phases, axis=-1)                        # (N, 16, 3*L1P)

    # Weights rearranged once into matmul-ready slabs (all tiny).
    w1 = jnp.pad(p["conv1_w"][:, 0].reshape(C, 9), ((0, 0), (0, 7)))       # (16, 16)
    b1 = p["conv1_b"].reshape(C, 1)
    w2s = jnp.transpose(p["conv2_w"], (2, 3, 0, 1)).reshape(9, C, C)       # (9, 16, 16)
    b2 = p["conv2_b"].reshape(C, 1)
    w3 = jnp.transpose(p["conv3_w"][:, :, 0, :], (2, 0, 1))                # (8, 16, 16)
    b3 = p["conv3_b"].reshape(C, 1)
    wc = p["tcn_dil_w"][-1][:, :, 2]                                       # centre tap
    bc = p["tcn_dil_b"][-1].reshape(C, 1)
    dw = p["dense_w"].reshape(C, 1)
    db = p["dense_b"].reshape(1, 1)

    # Precomputed pool2 selection matrix (exact 0/1), VMEM-resident input.
    p_idx = jnp.arange(LM2, dtype=jnp.int32)[:, None]
    q_idx = jnp.arange(NSEL, dtype=jnp.int32)[None, :]
    sel = ((q_idx % H1) * G1 + 3 * (q_idx // H1) == p_idx).astype(jnp.float32)

    bcast2 = lambda i: (0, 0)
    bcast3 = lambda i: (0, 0, 0)
    out = pl.pallas_call(
        _make_fused_kernel(C, H1, G1, G2, L1P),
        out_shape=jax.ShapeDtypeStruct((n, 1, H1), jnp.float32),
        grid=(n,),
        in_specs=[
            pl.BlockSpec((1, 16, 3 * L1P), lambda i: (i, 0, 0)),
            pl.BlockSpec((C, 16), bcast2),
            pl.BlockSpec((C, 1), bcast2),
            pl.BlockSpec((9, C, C), bcast3),
            pl.BlockSpec((C, 1), bcast2),
            pl.BlockSpec((LM2, NSEL), bcast2),
            pl.BlockSpec((G2, C, C), bcast3),
            pl.BlockSpec((C, 1), bcast2),
            pl.BlockSpec((C, C), bcast2),
            pl.BlockSpec((C, 1), bcast2),
            pl.BlockSpec((C, 1), bcast2),
            pl.BlockSpec((1, 1), bcast2),
        ],
        out_specs=pl.BlockSpec((1, 1, H1), lambda i: (i, 0, 0)),
        scratch_shapes=[
            pltpu.VMEM((C, XW), jnp.float32),   # H-padded pool1 (wide)
        ],
        compiler_params=pltpu.CompilerParams(dimension_semantics=("parallel",)),
    )(v, w1, b1, w2s, b2, sel, w3, b3, wc, bc, dw, db)
    return out[:, 0, :]


# ---------------------- pure-JAX reference (correctness check) -------------------
def _maxpool_w3_ref(y):
    n, c, hh, ww = y.shape
    wo = ww // 3
    return y[:, :, :, :wo * 3].reshape(n, c, hh, wo, 3).max(axis=-1)


def reference_forward(x, p):
    dn2d = ("NCHW", "OIHW", "NCHW")
    hp = jax.lax.Precision.HIGHEST
    y = jax.lax.conv_general_dilated(x, p["conv1_w"], (1, 1), ((1, 1), (0, 0)),
                                     dimension_numbers=dn2d, precision=hp)
    y = _maxpool_w3_ref(_elu(y + p["conv1_b"].reshape(1, -1, 1, 1)))
    y = jax.lax.conv_general_dilated(y, p["conv2_w"], (1, 1), ((1, 1), (0, 0)),
                                     dimension_numbers=dn2d, precision=hp)
    y = _maxpool_w3_ref(_elu(y + p["conv2_b"].reshape(1, -1, 1, 1)))
    y = jax.lax.conv_general_dilated(y, p["conv3_w"], (1, 1), ((0, 0), (0, 0)),
                                     dimension_numbers=dn2d, precision=hp)
    y = _elu(y + p["conv3_b"].reshape(1, -1, 1, 1))
    n, c, hh, ww = y.shape
    assert ww == 1
    y = y.reshape(n, c, hh)
    # Only network[-1] (dilation 2**10) survives the reference loop; its full
    # 5-tap 'same' dilated conv is reproduced here (validates the centre-tap
    # shortcut used inside the fused kernel).
    dil = 2 ** (NUM_LAYERS - 1)
    wd, bd = p["tcn_dil_w"][-1], p["tcn_dil_b"][-1]
    pad = dil * (5 - 1) // 2
    ypad = jnp.pad(y, ((0, 0), (0, 0), (pad, pad)))
    L = y.shape[-1]
    yb = bd.reshape(1, -1, 1)
    for j in range(5):
        yb = yb + jnp.einsum("oc,ncl->nol", wd[:, :, j],
                             ypad[:, :, j * dil:j * dil + L], precision=hp)
    yb = _elu(yb)
    return jnp.einsum("ncl,oc->nl", yb, p["dense_w"], precision=hp) + p["dense_b"][0]


# ----------------------------------- params --------------------------------------
def init_params(key):
    def _uniform(k, shape, fan_in):
        bound = 1.0 / (fan_in ** 0.5)
        return jax.random.uniform(k, shape, jnp.float32, -bound, bound)

    keys = iter(jax.random.split(key, 64))
    p = {}
    p["conv1_w"] = _uniform(next(keys), (16, 1, 3, 3), 1 * 3 * 3)
    p["conv1_b"] = _uniform(next(keys), (16,), 1 * 3 * 3)
    p["conv2_w"] = _uniform(next(keys), (16, 16, 3, 3), 16 * 3 * 3)
    p["conv2_b"] = _uniform(next(keys), (16,), 16 * 3 * 3)
    p["conv3_w"] = _uniform(next(keys), (16, 16, 1, 8), 16 * 1 * 8)
    p["conv3_b"] = _uniform(next(keys), (16,), 16 * 1 * 8)
    dil_w, dil_b, res_w, res_b = [], [], [], []
    for _ in range(NUM_LAYERS):
        dil_w.append(_uniform(next(keys), (16, 16, 5), 16 * 5))
        dil_b.append(_uniform(next(keys), (16,), 16 * 5))
        res_w.append(_uniform(next(keys), (16, 16, 1), 16))  # conv_1d (dead code)
        res_b.append(_uniform(next(keys), (16,), 16))
    p["tcn_dil_w"], p["tcn_dil_b"] = dil_w, dil_b
    p["tcn_res_w"], p["tcn_res_b"] = res_w, res_b
    p["dense_w"] = _uniform(next(keys), (1, 16), 16)
    p["dense_b"] = _uniform(next(keys), (1,), 16)
    return p


if __name__ == "__main__":
    key = jax.random.PRNGKey(0)
    kp, kx = jax.random.split(key)
    params = init_params(kp)
    # NCHW input; W=80 so the feature extractor collapses the last axis to 1
    # (80 -> conv 78 -> pool 26 -> conv 24 -> pool 8 -> conv(1x8) 1), which the
    # reference .view(-1, C, H) requires.
    x = jax.random.normal(kx, (2, 1, 16, 80), jnp.float32)
    out = jax.jit(tcn_model_forward)(x, params)
    out = jax.block_until_ready(out)
    assert out.shape == (2, 16), out.shape
    assert bool(jnp.all(jnp.isfinite(out)))
    ref = reference_forward(x, params)
    err = float(jnp.max(jnp.abs(out - ref)))
    assert err < 5e-2, f"mismatch vs pure-JAX reference: max|diff|={err}"
    print("KERNEL_OK")
</pallas_src>

<mosaic_0001>
module attributes {stable_mosaic.version = 11 : i64} {
  func.func @kernel(%arg0: i32, %arg1: memref<1x16x1536xf32, #tpu.memory_space<vmem>>, %arg2: memref<16x16xf32, #tpu.memory_space<vmem>>, %arg3: memref<16x1xf32, #tpu.memory_space<vmem>>, %arg4: memref<9x16x16xf32, #tpu.memory_space<vmem>>, %arg5: memref<16x1xf32, #tpu.memory_space<vmem>>, %arg6: memref<414x128xf32, #tpu.memory_space<vmem>>, %arg7: memref<8x16x16xf32, #tpu.memory_space<vmem>>, %arg8: memref<16x1xf32, #tpu.memory_space<vmem>>, %arg9: memref<16x16xf32, #tpu.memory_space<vmem>>, %arg10: memref<16x1xf32, #tpu.memory_space<vmem>>, %arg11: memref<16x1xf32, #tpu.memory_space<vmem>>, %arg12: memref<1x1xf32, #tpu.memory_space<vmem>>, %arg13: memref<1x1x16xf32, #tpu.memory_space<vmem>>, %arg14: memref<16x470xf32, #tpu.memory_space<vmem>>) attributes {dimension_semantics = [#tpu.dimension_semantics<parallel>], iteration_bounds = array<i64: 2>, scalar_prefetch = 0 : i64, scratch_operands = 1 : i64, tpu.core_type = #tpu.core_type<tc>, window_params = [{transform_indices = @transform_0, window_bounds = array<i64: 1, 16, 1536>}, {pipeline_mode = #tpu.pipeline_mode<synchronous>, transform_indices = @transform_1, window_bounds = array<i64: 16, 16>}, {pipeline_mode = #tpu.pipeline_mode<synchronous>, transform_indices = @transform_2, window_bounds = array<i64: 16, 1>}, {pipeline_mode = #tpu.pipeline_mode<synchronous>, transform_indices = @transform_3, window_bounds = array<i64: 9, 16, 16>}, {pipeline_mode = #tpu.pipeline_mode<synchronous>, transform_indices = @transform_4, window_bounds = array<i64: 16, 1>}, {pipeline_mode = #tpu.pipeline_mode<synchronous>, transform_indices = @transform_5, window_bounds = array<i64: 414, 128>}, {pipeline_mode = #tpu.pipeline_mode<synchronous>, transform_indices = @transform_6, window_bounds = array<i64: 8, 16, 16>}, {pipeline_mode = #tpu.pipeline_mode<synchronous>, transform_indices = @transform_7, window_bounds = array<i64: 16, 1>}, {pipeline_mode = #tpu.pipeline_mode<synchronous>, transform_indices = @transform_8, window_bounds = array<i64: 16, 16>}, {pipeline_mode = #tpu.pipeline_mode<synchronous>, transform_indices = @transform_9, window_bounds = array<i64: 16, 1>}, {pipeline_mode = #tpu.pipeline_mode<synchronous>, transform_indices = @transform_10, window_bounds = array<i64: 16, 1>}, {pipeline_mode = #tpu.pipeline_mode<synchronous>, transform_indices = @transform_11, window_bounds = array<i64: 1, 1>}, {transform_indices = @transform_12, window_bounds = array<i64: 1, 1, 16>}]} {
    %c0 = arith.constant 0 : index
    %c0_0 = arith.constant 0 : index
    %0 = vector.load %arg2[%c0, %c0_0] : memref<16x16xf32, #tpu.memory_space<vmem>>, vector<16x16xf32>
    %c0_1 = arith.constant 0 : index
    %c0_2 = arith.constant 0 : index
    %c0_3 = arith.constant 0 : index
    %1 = vector.load %arg1[%c0_1, %c0_2, %c0_3] : memref<1x16x1536xf32, #tpu.memory_space<vmem>>, vector<1x16x1536xf32>
    %2 = vector.shape_cast %1 : vector<1x16x1536xf32> to vector<16x1536xf32>
    %cst = arith.constant dense<0.000000e+00> : vector<16x1536xf32>
    %3 = tpu.matmul %0, %2, %cst {dimension_numbers = #tpu.dot_dimension_numbers<[1], [0], [0], [1], [0, 0, 1, 1], [], []>} : vector<16x16xf32>, vector<16x1536xf32>, vector<16x1536xf32> -> vector<16x1536xf32>
    %4 = vector.extract_strided_slice %3 {offsets = [0, 0], sizes = [16, 512], strides = [1, 1]} : vector<16x1536xf32> to vector<16x512xf32>
    %5 = vector.extract_strided_slice %3 {offsets = [0, 512], sizes = [16, 512], strides = [1, 1]} : vector<16x1536xf32> to vector<16x512xf32>
    %6 = arith.maximumf %4, %5 : vector<16x512xf32>
    %7 = vector.extract_strided_slice %3 {offsets = [0, 1024], sizes = [16, 512], strides = [1, 1]} : vector<16x1536xf32> to vector<16x512xf32>
    %8 = arith.maximumf %6, %7 : vector<16x512xf32>
    %9 = vector.extract_strided_slice %8 {offsets = [0, 0], sizes = [16, 416], strides = [1, 1]} : vector<16x512xf32> to vector<16x416xf32>
    %c0_4 = arith.constant 0 : index
    %c0_5 = arith.constant 0 : index
    %10 = vector.load %arg3[%c0_4, %c0_5] : memref<16x1xf32, #tpu.memory_space<vmem>>, vector<16x1xf32>
    %11 = vector.broadcast %10 : vector<16x1xf32> to vector<16x416xf32>
    %12 = arith.addf %9, %11 : vector<16x416xf32>
    %cst_6 = arith.constant 0.000000e+00 : f32
    %13 = vector.broadcast %cst_6 : f32 to vector<16x416xf32>
    %14 = arith.cmpf ogt, %12, %13 : vector<16x416xf32>
    %cst_7 = arith.constant 0.000000e+00 : f32
    %15 = vector.broadcast %cst_7 : f32 to vector<16x416xf32>
    %16 = arith.minimumf %12, %15 : vector<16x416xf32>
    %17 = math.exp %16 : vector<16x416xf32>
    %cst_8 = arith.constant 1.000000e+00 : f32
    %18 = vector.broadcast %cst_8 : f32 to vector<16x416xf32>
    %19 = arith.subf %17, %18 : vector<16x416xf32>
    %20 = arith.select %14, %12, %19 : vector<16x416xi1>, vector<16x416xf32>
    %cst_9 = arith.constant 0.000000e+00 : f32
    %21 = vector.broadcast %cst_9 : f32 to vector<16x26xf32>
    %c0_10 = arith.constant 0 : index
    %c0_11 = arith.constant 0 : index
    %22 = vector.load %arg14[%c0_10, %c0_11] : memref<16x470xf32, #tpu.memory_space<vmem>>, vector<16x26xf32>
    tpu.vector_store %arg14[%c0_10, %c0_11], %21 {strides = array<i32>} : memref<16x470xf32, #tpu.memory_space<vmem>>, vector<16x26xf32>,
    %cst_12 = arith.constant 0.000000e+00 : f32
    %23 = vector.broadcast %cst_12 : f32 to vector<16x28xf32>
    %c0_13 = arith.constant 0 : index
    %c442 = arith.constant 442 : index
    %24 = vector.load %arg14[%c0_13, %c442] : memref<16x470xf32, #tpu.memory_space<vmem>>, vector<16x28xf32>
    tpu.vector_store %arg14[%c0_13, %c442], %23 {strides = array<i32>} : memref<16x470xf32, #tpu.memory_space<vmem>>, vector<16x28xf32>,
    %c0_14 = arith.constant 0 : index
    %c26 = arith.constant 26 : index
    %25 = vector.load %arg14[%c0_14, %c26] : memref<16x470xf32, #tpu.memory_space<vmem>>, vector<16x416xf32>
    tpu.vector_store %arg14[%c0_14, %c26], %20 {strides = array<i32>} : memref<16x470xf32, #tpu.memory_space<vmem>>, vector<16x416xf32>,
    %cst_15 = arith.constant 0.000000e+00 : f32
    %26 = vector.broadcast %cst_15 : f32 to vector<16x416xf32>
    %c0_16 = arith.constant 0 : index
    %c0_17 = arith.constant 0 : index
    %c0_18 = arith.constant 0 : index
    %27 = vector.load %arg4[%c0_16, %c0_17, %c0_18] : memref<9x16x16xf32, #tpu.memory_space<vmem>>, vector<1x16x16xf32>
    %28 = vector.shape_cast %27 : vector<1x16x16xf32> to vector<16x16xf32>
    %c0_19 = arith.constant 0 : index
    %c0_20 = arith.constant 0 : index
    %29 = vector.load %arg14[%c0_19, %c0_20] : memref<16x470xf32, #tpu.memory_space<vmem>>, vector<16x416xf32>
    %cst_21 = arith.constant dense<0.000000e+00> : vector<16x416xf32>
    %30 = tpu.matmul %28, %29, %cst_21 {dimension_numbers = #tpu.dot_dimension_numbers<[1], [0], [0], [1], [0, 0, 1, 1], [], []>} : vector<16x16xf32>, vector<16x416xf32>, vector<16x416xf32> -> vector<16x416xf32>
    %31 = arith.addf %26, %30 : vector<16x416xf32>
    %c1 = arith.constant 1 : index
    %c0_22 = arith.constant 0 : index
    %c0_23 = arith.constant 0 : index
    %32 = vector.load %arg4[%c1, %c0_22, %c0_23] : memref<9x16x16xf32, #tpu.memory_space<vmem>>, vector<1x16x16xf32>
    %33 = vector.shape_cast %32 : vector<1x16x16xf32> to vector<16x16xf32>
    %c0_24 = arith.constant 0 : index
    %c1_25 = arith.constant 1 : index
    %34 = vector.load %arg14[%c0_24, %c1_25] : memref<16x470xf32, #tpu.memory_space<vmem>>, vector<16x416xf32>
    %cst_26 = arith.constant dense<0.000000e+00> : vector<16x416xf32>
    %35 = tpu.matmul %33, %34, %cst_26 {dimension_numbers = #tpu.dot_dimension_numbers<[1], [0], [0], [1], [0, 0, 1, 1], [], []>} : vector<16x16xf32>, vector<16x416xf32>, vector<16x416xf32> -> vector<16x416xf32>
    %36 = arith.addf %31, %35 : vector<16x416xf32>
    %c2 = arith.constant 2 : index
    %c0_27 = arith.constant 0 : index
    %c0_28 = arith.constant 0 : index
    %37 = vector.load %arg4[%c2, %c0_27, %c0_28] : memref<9x16x16xf32, #tpu.memory_space<vmem>>, vector<1x16x16xf32>
    %38 = vector.shape_cast %37 : vector<1x16x16xf32> to vector<16x16xf32>
    %c0_29 = arith.constant 0 : index
    %c2_30 = arith.constant 2 : index
    %39 = vector.load %arg14[%c0_29, %c2_30] : memref<16x470xf32, #tpu.memory_space<vmem>>, vector<16x416xf32>
    %cst_31 = arith.constant dense<0.000000e+00> : vector<16x416xf32>
    %40 = tpu.matmul %38, %39, %cst_31 {dimension_numbers = #tpu.dot_dimension_numbers<[1], [0], [0], [1], [0, 0, 1, 1], [], []>} : vector<16x16xf32>, vector<16x416xf32>, vector<16x416xf32> -> vector<16x416xf32>
    %41 = arith.addf %36, %40 : vector<16x416xf32>
    %c3 = arith.constant 3 : index
    %c0_32 = arith.constant 0 : index
    %c0_33 = arith.constant 0 : index
    %42 = vector.load %arg4[%c3, %c0_32, %c0_33] : memref<9x16x16xf32, #tpu.memory_space<vmem>>, vector<1x16x16xf32>
    %43 = vector.shape_cast %42 : vector<1x16x16xf32> to vector<16x16xf32>
    %c0_34 = arith.constant 0 : index
    %c26_35 = arith.constant 26 : index
    %44 = vector.load %arg14[%c0_34, %c26_35] : memref<16x470xf32, #tpu.memory_space<vmem>>, vector<16x416xf32>
    %cst_36 = arith.constant dense<0.000000e+00> : vector<16x416xf32>
    %45 = tpu.matmul %43, %44, %cst_36 {dimension_numbers = #tpu.dot_dimension_numbers<[1], [0], [0], [1], [0, 0, 1, 1], [], []>} : vector<16x16xf32>, vector<16x416xf32>, vector<16x416xf32> -> vector<16x416xf32>
    %46 = arith.addf %41, %45 : vector<16x416xf32>
    %c4 = arith.constant 4 : index
    %c0_37 = arith.constant 0 : index
    %c0_38 = arith.constant 0 : index
    %47 = vector.load %arg4[%c4, %c0_37, %c0_38] : memref<9x16x16xf32, #tpu.memory_space<vmem>>, vector<1x16x16xf32>
    %48 = vector.shape_cast %47 : vector<1x16x16xf32> to vector<16x16xf32>
    %c0_39 = arith.constant 0 : index
    %c27 = arith.constant 27 : index
    %49 = vector.load %arg14[%c0_39, %c27] : memref<16x470xf32, #tpu.memory_space<vmem>>, vector<16x416xf32>
    %cst_40 = arith.constant dense<0.000000e+00> : vector<16x416xf32>
    %50 = tpu.matmul %48, %49, %cst_40 {dimension_numbers = #tpu.dot_dimension_numbers<[1], [0], [0], [1], [0, 0, 1, 1], [], []>} : vector<16x16xf32>, vector<16x416xf32>, vector<16x416xf32> -> vector<16x416xf32>
    %51 = arith.addf %46, %50 : vector<16x416xf32>
    %c5 = arith.constant 5 : index
    %c0_41 = arith.constant 0 : index
    %c0_42 = arith.constant 0 : index
    %52 = vector.load %arg4[%c5, %c0_41, %c0_42] : memref<9x16x16xf32, #tpu.memory_space<vmem>>, vector<1x16x16xf32>
    %53 = vector.shape_cast %52 : vector<1x16x16xf32> to vector<16x16xf32>
    %c0_43 = arith.constant 0 : index
    %c28 = arith.constant 28 : index
    %54 = vector.load %arg14[%c0_43, %c28] : memref<16x470xf32, #tpu.memory_space<vmem>>, vector<16x416xf32>
    %cst_44 = arith.constant dense<0.000000e+00> : vector<16x416xf32>
    %55 = tpu.matmul %53, %54, %cst_44 {dimension_numbers = #tpu.dot_dimension_numbers<[1], [0], [0], [1], [0, 0, 1, 1], [], []>} : vector<16x16xf32>, vector<16x416xf32>, vector<16x416xf32> -> vector<16x416xf32>
    %56 = arith.addf %51, %55 : vector<16x416xf32>
    %c6 = arith.constant 6 : index
    %c0_45 = arith.constant 0 : index
    %c0_46 = arith.constant 0 : index
    %57 = vector.load %arg4[%c6, %c0_45, %c0_46] : memref<9x16x16xf32, #tpu.memory_space<vmem>>, vector<1x16x16xf32>
    %58 = vector.shape_cast %57 : vector<1x16x16xf32> to vector<16x16xf32>
    %c0_47 = arith.constant 0 : index
    %c52 = arith.constant 52 : index
    %59 = vector.load %arg14[%c0_47, %c52] : memref<16x470xf32, #tpu.memory_space<vmem>>, vector<16x416xf32>
    %cst_48 = arith.constant dense<0.000000e+00> : vector<16x416xf32>
    %60 = tpu.matmul %58, %59, %cst_48 {dimension_numbers = #tpu.dot_dimension_numbers<[1], [0], [0], [1], [0, 0, 1, 1], [], []>} : vector<16x16xf32>, vector<16x416xf32>, vector<16x416xf32> -> vector<16x416xf32>
    %61 = arith.addf %56, %60 : vector<16x416xf32>
    %c7 = arith.constant 7 : index
    %c0_49 = arith.constant 0 : index
    %c0_50 = arith.constant 0 : index
    %62 = vector.load %arg4[%c7, %c0_49, %c0_50] : memref<9x16x16xf32, #tpu.memory_space<vmem>>, vector<1x16x16xf32>
    %63 = vector.shape_cast %62 : vector<1x16x16xf32> to vector<16x16xf32>
    %c0_51 = arith.constant 0 : index
    %c53 = arith.constant 53 : index
    %64 = vector.load %arg14[%c0_51, %c53] : memref<16x470xf32, #tpu.memory_space<vmem>>, vector<16x416xf32>
    %cst_52 = arith.constant dense<0.000000e+00> : vector<16x416xf32>
    %65 = tpu.matmul %63, %64, %cst_52 {dimension_numbers = #tpu.dot_dimension_numbers<[1], [0], [0], [1], [0, 0, 1, 1], [], []>} : vector<16x16xf32>, vector<16x416xf32>, vector<16x416xf32> -> vector<16x416xf32>
    %66 = arith.addf %61, %65 : vector<16x416xf32>
    %c8 = arith.constant 8 : index
    %c0_53 = arith.constant 0 : index
    %c0_54 = arith.constant 0 : index
    %67 = vector.load %arg4[%c8, %c0_53, %c0_54] : memref<9x16x16xf32, #tpu.memory_space<vmem>>, vector<1x16x16xf32>
    %68 = vector.shape_cast %67 : vector<1x16x16xf32> to vector<16x16xf32>
    %c0_55 = arith.constant 0 : index
    %c54 = arith.constant 54 : index
    %69 = vector.load %arg14[%c0_55, %c54] : memref<16x470xf32, #tpu.memory_space<vmem>>, vector<16x416xf32>
    %cst_56 = arith.constant dense<0.000000e+00> : vector<16x416xf32>
    %70 = tpu.matmul %68, %69, %cst_56 {dimension_numbers = #tpu.dot_dimension_numbers<[1], [0], [0], [1], [0, 0, 1, 1], [], []>} : vector<16x16xf32>, vector<16x416xf32>, vector<16x416xf32> -> vector<16x416xf32>
    %71 = arith.addf %66, %70 : vector<16x416xf32>
    %72 = vector.extract_strided_slice %71 {offsets = [0, 0], sizes = [16, 414], strides = [1, 1]} : vector<16x416xf32> to vector<16x414xf32>
    %73 = vector.extract_strided_slice %71 {offsets = [0, 1], sizes = [16, 414], strides = [1, 1]} : vector<16x416xf32> to vector<16x414xf32>
    %74 = arith.maximumf %72, %73 : vector<16x414xf32>
    %75 = vector.extract_strided_slice %71 {offsets = [0, 2], sizes = [16, 414], strides = [1, 1]} : vector<16x416xf32> to vector<16x414xf32>
    %76 = arith.maximumf %74, %75 : vector<16x414xf32>
    %c0_57 = arith.constant 0 : index
    %c0_58 = arith.constant 0 : index
    %77 = vector.load %arg6[%c0_57, %c0_58] : memref<414x128xf32, #tpu.memory_space<vmem>>, vector<414x128xf32>
    %cst_59 = arith.constant dense<0.000000e+00> : vector<16x128xf32>
    %78 = tpu.matmul %76, %77, %cst_59 {dimension_numbers = #tpu.dot_dimension_numbers<[1], [0], [0], [1], [0, 0, 1, 1], [], []>} : vector<16x414xf32>, vector<414x128xf32>, vector<16x128xf32> -> vector<16x128xf32>
    %c0_60 = arith.constant 0 : index
    %c0_61 = arith.constant 0 : index
    %79 = vector.load %arg5[%c0_60, %c0_61] : memref<16x1xf32, #tpu.memory_space<vmem>>, vector<16x1xf32>
    %80 = vector.broadcast %79 : vector<16x1xf32> to vector<16x128xf32>
    %81 = arith.addf %78, %80 : vector<16x128xf32>
    %cst_62 = arith.constant 0.000000e+00 : f32
    %82 = vector.broadcast %cst_62 : f32 to vector<16x128xf32>
    %83 = arith.cmpf ogt, %81, %82 : vector<16x128xf32>
    %cst_63 = arith.constant 0.000000e+00 : f32
    %84 = vector.broadcast %cst_63 : f32 to vector<16x128xf32>
    %85 = arith.minimumf %81, %84 : vector<16x128xf32>
    %86 = math.exp %85 : vector<16x128xf32>
    %cst_64 = arith.constant 1.000000e+00 : f32
    %87 = vector.broadcast %cst_64 : f32 to vector<16x128xf32>
    %88 = arith.subf %86, %87 : vector<16x128xf32>
    %89 = arith.select %83, %81, %88 : vector<16x128xi1>, vector<16x128xf32>
    %cst_65 = arith.constant 0.000000e+00 : f32
    %90 = vector.broadcast %cst_65 : f32 to vector<16x16xf32>
    %c0_66 = arith.constant 0 : index
    %c0_67 = arith.constant 0 : index
    %91 = vector.load %arg8[%c0_66, %c0_67] : memref<16x1xf32, #tpu.memory_space<vmem>>, vector<16x1xf32>
    %92 = vector.broadcast %91 : vector<16x1xf32> to vector<16x16xf32>
    %93 = arith.addf %90, %92 : vector<16x16xf32>
    %c0_68 = arith.constant 0 : index
    %c0_69 = arith.constant 0 : index
    %c0_70 = arith.constant 0 : index
    %94 = vector.load %arg7[%c0_68, %c0_69, %c0_70] : memref<8x16x16xf32, #tpu.memory_space<vmem>>, vector<1x16x16xf32>
    %95 = vector.shape_cast %94 : vector<1x16x16xf32> to vector<16x16xf32>
    %96 = vector.extract_strided_slice %89 {offsets = [0, 0], sizes = [16, 16], strides = [1, 1]} : vector<16x128xf32> to vector<16x16xf32>
    %cst_71 = arith.constant dense<0.000000e+00> : vector<16x16xf32>
    %97 = tpu.matmul %95, %96, %cst_71 {dimension_numbers = #tpu.dot_dimension_numbers<[1], [0], [0], [1], [0, 0, 1, 1], [], []>} : vector<16x16xf32>, vector<16x16xf32>, vector<16x16xf32> -> vector<16x16xf32>
    %98 = arith.addf %93, %97 : vector<16x16xf32>
    %c1_72 = arith.constant 1 : index
    %c0_73 = arith.constant 0 : index
    %c0_74 = arith.constant 0 : index
    %99 = vector.load %arg7[%c1_72, %c0_73, %c0_74] : memref<8x16x16xf32, #tpu.memory_space<vmem>>, vector<1x16x16xf32>
    %100 = vector.shape_cast %99 : vector<1x16x16xf32> to vector<16x16xf32>
    %101 = vector.extract_strided_slice %89 {offsets = [0, 16], sizes = [16, 16], strides = [1, 1]} : vector<16x128xf32> to vector<16x16xf32>
    %cst_75 = arith.constant dense<0.000000e+00> : vector<16x16xf32>
    %102 = tpu.matmul %100, %101, %cst_75 {dimension_numbers = #tpu.dot_dimension_numbers<[1], [0], [0], [1], [0, 0, 1, 1], [], []>} : vector<16x16xf32>, vector<16x16xf32>, vector<16x16xf32> -> vector<16x16xf32>
    %103 = arith.addf %98, %102 : vector<16x16xf32>
    %c2_76 = arith.constant 2 : index
    %c0_77 = arith.constant 0 : index
    %c0_78 = arith.constant 0 : index
    %104 = vector.load %arg7[%c2_76, %c0_77, %c0_78] : memref<8x16x16xf32, #tpu.memory_space<vmem>>, vector<1x16x16xf32>
    %105 = vector.shape_cast %104 : vector<1x16x16xf32> to vector<16x16xf32>
    %106 = vector.extract_strided_slice %89 {offsets = [0, 32], sizes = [16, 16], strides = [1, 1]} : vector<16x128xf32> to vector<16x16xf32>
    %cst_79 = arith.constant dense<0.000000e+00> : vector<16x16xf32>
    %107 = tpu.matmul %105, %106, %cst_79 {dimension_numbers = #tpu.dot_dimension_numbers<[1], [0], [0], [1], [0, 0, 1, 1], [], []>} : vector<16x16xf32>, vector<16x16xf32>, vector<16x16xf32> -> vector<16x16xf32>
    %108 = arith.addf %103, %107 : vector<16x16xf32>
    %c3_80 = arith.constant 3 : index
    %c0_81 = arith.constant 0 : index
    %c0_82 = arith.constant 0 : index
    %109 = vector.load %arg7[%c3_80, %c0_81, %c0_82] : memref<8x16x16xf32, #tpu.memory_space<vmem>>, vector<1x16x16xf32>
    %110 = vector.shape_cast %109 : vector<1x16x16xf32> to vector<16x16xf32>
    %111 = vector.extract_strided_slice %89 {offsets = [0, 48], sizes = [16, 16], strides = [1, 1]} : vector<16x128xf32> to vector<16x16xf32>
    %cst_83 = arith.constant dense<0.000000e+00> : vector<16x16xf32>
    %112 = tpu.matmul %110, %111, %cst_83 {dimension_numbers = #tpu.dot_dimension_numbers<[1], [0], [0], [1], [0, 0, 1, 1], [], []>} : vector<16x16xf32>, vector<16x16xf32>, vector<16x16xf32> -> vector<16x16xf32>
    %113 = arith.addf %108, %112 : vector<16x16xf32>
    %c4_84 = arith.constant 4 : index
    %c0_85 = arith.constant 0 : index
    %c0_86 = arith.constant 0 : index
    %114 = vector.load %arg7[%c4_84, %c0_85, %c0_86] : memref<8x16x16xf32, #tpu.memory_space<vmem>>, vector<1x16x16xf32>
    %115 = vector.shape_cast %114 : vector<1x16x16xf32> to vector<16x16xf32>
    %116 = vector.extract_strided_slice %89 {offsets = [0, 64], sizes = [16, 16], strides = [1, 1]} : vector<16x128xf32> to vector<16x16xf32>
    %cst_87 = arith.constant dense<0.000000e+00> : vector<16x16xf32>
    %117 = tpu.matmul %115, %116, %cst_87 {dimension_numbers = #tpu.dot_dimension_numbers<[1], [0], [0], [1], [0, 0, 1, 1], [], []>} : vector<16x16xf32>, vector<16x16xf32>, vector<16x16xf32> -> vector<16x16xf32>
    %118 = arith.addf %113, %117 : vector<16x16xf32>
    %c5_88 = arith.constant 5 : index
    %c0_89 = arith.constant 0 : index
    %c0_90 = arith.constant 0 : index
    %119 = vector.load %arg7[%c5_88, %c0_89, %c0_90] : memref<8x16x16xf32, #tpu.memory_space<vmem>>, vector<1x16x16xf32>
    %120 = vector.shape_cast %119 : vector<1x16x16xf32> to vector<16x16xf32>
    %121 = vector.extract_strided_slice %89 {offsets = [0, 80], sizes = [16, 16], strides = [1, 1]} : vector<16x128xf32> to vector<16x16xf32>
    %cst_91 = arith.constant dense<0.000000e+00> : vector<16x16xf32>
    %122 = tpu.matmul %120, %121, %cst_91 {dimension_numbers = #tpu.dot_dimension_numbers<[1], [0], [0], [1], [0, 0, 1, 1], [], []>} : vector<16x16xf32>, vector<16x16xf32>, vector<16x16xf32> -> vector<16x16xf32>
    %123 = arith.addf %118, %122 : vector<16x16xf32>
    %c6_92 = arith.constant 6 : index
    %c0_93 = arith.constant 0 : index
    %c0_94 = arith.constant 0 : index
    %124 = vector.load %arg7[%c6_92, %c0_93, %c0_94] : memref<8x16x16xf32, #tpu.memory_space<vmem>>, vector<1x16x16xf32>
    %125 = vector.shape_cast %124 : vector<1x16x16xf32> to vector<16x16xf32>
    %126 = vector.extract_strided_slice %89 {offsets = [0, 96], sizes = [16, 16], strides = [1, 1]} : vector<16x128xf32> to vector<16x16xf32>
    %cst_95 = arith.constant dense<0.000000e+00> : vector<16x16xf32>
    %127 = tpu.matmul %125, %126, %cst_95 {dimension_numbers = #tpu.dot_dimension_numbers<[1], [0], [0], [1], [0, 0, 1, 1], [], []>} : vector<16x16xf32>, vector<16x16xf32>, vector<16x16xf32> -> vector<16x16xf32>
    %128 = arith.addf %123, %127 : vector<16x16xf32>
    %c7_96 = arith.constant 7 : index
    %c0_97 = arith.constant 0 : index
    %c0_98 = arith.constant 0 : index
    %129 = vector.load %arg7[%c7_96, %c0_97, %c0_98] : memref<8x16x16xf32, #tpu.memory_space<vmem>>, vector<1x16x16xf32>
    %130 = vector.shape_cast %129 : vector<1x16x16xf32> to vector<16x16xf32>
    %131 = vector.extract_strided_slice %89 {offsets = [0, 112], sizes = [16, 16], strides = [1, 1]} : vector<16x128xf32> to vector<16x16xf32>
    %cst_99 = arith.constant dense<0.000000e+00> : vector<16x16xf32>
    %132 = tpu.matmul %130, %131, %cst_99 {dimension_numbers = #tpu.dot_dimension_numbers<[1], [0], [0], [1], [0, 0, 1, 1], [], []>} : vector<16x16xf32>, vector<16x16xf32>, vector<16x16xf32> -> vector<16x16xf32>
    %133 = arith.addf %128, %132 : vector<16x16xf32>
    %cst_100 = arith.constant 0.000000e+00 : f32
    %134 = vector.broadcast %cst_100 : f32 to vector<16x16xf32>
    %135 = arith.cmpf ogt, %133, %134 : vector<16x16xf32>
    %cst_101 = arith.constant 0.000000e+00 : f32
    %136 = vector.broadcast %cst_101 : f32 to vector<16x16xf32>
    %137 = arith.minimumf %133, %136 : vector<16x16xf32>
    %138 = math.exp %137 : vector<16x16xf32>
    %cst_102 = arith.constant 1.000000e+00 : f32
    %139 = vector.broadcast %cst_102 : f32 to vector<16x16xf32>
    %140 = arith.subf %138, %139 : vector<16x16xf32>
    %141 = arith.select %135, %133, %140 : vector<16x16xi1>, vector<16x16xf32>
    %c0_103 = arith.constant 0 : index
    %c0_104 = arith.constant 0 : index
    %142 = vector.load %arg9[%c0_103, %c0_104] : memref<16x16xf32, #tpu.memory_space<vmem>>, vector<16x16xf32>
    %cst_105 = arith.constant dense<0.000000e+00> : vector<16x16xf32>
    %143 = tpu.matmul %142, %141, %cst_105 {dimension_numbers = #tpu.dot_dimension_numbers<[1], [0], [0], [1], [0, 0, 1, 1], [], []>} : vector<16x16xf32>, vector<16x16xf32>, vector<16x16xf32> -> vector<16x16xf32>
    %c0_106 = arith.constant 0 : index
    %c0_107 = arith.constant 0 : index
    %144 = vector.load %arg10[%c0_106, %c0_107] : memref<16x1xf32, #tpu.memory_space<vmem>>, vector<16x1xf32>
    %145 = vector.broadcast %144 : vector<16x1xf32> to vector<16x16xf32>
    %146 = arith.addf %143, %145 : vector<16x16xf32>
    %cst_108 = arith.constant 0.000000e+00 : f32
    %147 = vector.broadcast %cst_108 : f32 to vector<16x16xf32>
    %148 = arith.cmpf ogt, %146, %147 : vector<16x16xf32>
    %cst_109 = arith.constant 0.000000e+00 : f32
    %149 = vector.broadcast %cst_109 : f32 to vector<16x16xf32>
    %150 = arith.minimumf %146, %149 : vector<16x16xf32>
    %151 = math.exp %150 : vector<16x16xf32>
    %cst_110 = arith.constant 1.000000e+00 : f32
    %152 = vector.broadcast %cst_110 : f32 to vector<16x16xf32>
    %153 = arith.subf %151, %152 : vector<16x16xf32>
    %154 = arith.select %148, %146, %153 : vector<16x16xi1>, vector<16x16xf32>
    %c0_111 = arith.constant 0 : index
    %c0_112 = arith.constant 0 : index
    %155 = vector.load %arg11[%c0_111, %c0_112] : memref<16x1xf32, #tpu.memory_space<vmem>>, vector<16x1xf32>
    %156 = vector.broadcast %155 : vector<16x1xf32> to vector<16x16xf32>
    %157 = arith.mulf %156, %154 : vector<16x16xf32>
    %cst_113 = arith.constant dense<0.000000e+00> : vector<16xf32>
    %158 = vector.multi_reduction <add>, %157, %cst_113 [0] : vector<16x16xf32> to vector<16xf32>
    %159 = vector.shape_cast %158 : vector<16xf32> to vector<1x16xf32>
    %c0_114 = arith.constant 0 : index
    %c0_115 = arith.constant 0 : index
    %160 = vector.load %arg12[%c0_114, %c0_115] : memref<1x1xf32, #tpu.memory_space<vmem>>, vector<1x1xf32>
    %161 = vector.broadcast %160 : vector<1x1xf32> to vector<1x16xf32>
    %162 = arith.addf %159, %161 : vector<1x16xf32>
    %c0_116 = arith.constant 0 : index
    %c0_117 = arith.constant 0 : index
    %c0_118 = arith.constant 0 : index
    %163 = vector.load %arg13[%c0_116, %c0_117, %c0_118] : memref<1x1x16xf32, #tpu.memory_space<vmem>>, vector<1x1x16xf32>
    %164 = vector.shape_cast %163 : vector<1x1x16xf32> to vector<1x16xf32>
    %165 = vector.shape_cast %162 : vector<1x16xf32> to vector<1x1x16xf32>
    tpu.vector_store %arg13[%c0_116, %c0_117, %c0_118], %165 {strides = array<i32>} : memref<1x1x16xf32, #tpu.memory_space<vmem>>, vector<1x1x16xf32>,
    return
  }
  func.func @transform_0(%arg0: i32) -> (i32, i32, i32) {
    %c0_i32 = arith.constant 0 : i32
    %c0_i32_0 = arith.constant 0 : i32
    %c0_i32_1 = arith.constant 0 : i32
    return %arg0, %c0_i32, %c0_i32_0 : i32, i32, i32
  }
  func.func @transform_1(%arg0: i32) -> (i32, i32) {
    %c0_i32 = arith.constant 0 : i32
    %c0_i32_0 = arith.constant 0 : i32
    %c0_i32_1 = arith.constant 0 : i32
    return %c0_i32, %c0_i32_0 : i32, i32
  }
  func.func @transform_2(%arg0: i32) -> (i32, i32) {
    %c0_i32 = arith.constant 0 : i32
    %c0_i32_0 = arith.constant 0 : i32
    %c0_i32_1 = arith.constant 0 : i32
    return %c0_i32, %c0_i32_0 : i32, i32
  }
  func.func @transform_3(%arg0: i32) -> (i32, i32, i32) {
    %c0_i32 = arith.constant 0 : i32
    %c0_i32_0 = arith.constant 0 : i32
    %c0_i32_1 = arith.constant 0 : i32
    %c0_i32_2 = arith.constant 0 : i32
    return %c0_i32, %c0_i32_0, %c0_i32_1 : i32, i32, i32
  }
  func.func @transform_4(%arg0: i32) -> (i32, i32) {
    %c0_i32 = arith.constant 0 : i32
    %c0_i32_0 = arith.constant 0 : i32
    %c0_i32_1 = arith.constant 0 : i32
    return %c0_i32, %c0_i32_0 : i32, i32
  }
  func.func @transform_5(%arg0: i32) -> (i32, i32) {
    %c0_i32 = arith.constant 0 : i32
    %c0_i32_0 = arith.constant 0 : i32
    %c0_i32_1 = arith.constant 0 : i32
    return %c0_i32, %c0_i32_0 : i32, i32
  }
  func.func @transform_6(%arg0: i32) -> (i32, i32, i32) {
    %c0_i32 = arith.constant 0 : i32
    %c0_i32_0 = arith.constant 0 : i32
    %c0_i32_1 = arith.constant 0 : i32
    %c0_i32_2 = arith.constant 0 : i32
    return %c0_i32, %c0_i32_0, %c0_i32_1 : i32, i32, i32
  }
  func.func @transform_7(%arg0: i32) -> (i32, i32) {
    %c0_i32 = arith.constant 0 : i32
    %c0_i32_0 = arith.constant 0 : i32
    %c0_i32_1 = arith.constant 0 : i32
    return %c0_i32, %c0_i32_0 : i32, i32
  }
  func.func @transform_8(%arg0: i32) -> (i32, i32) {
    %c0_i32 = arith.constant 0 : i32
    %c0_i32_0 = arith.constant 0 : i32
    %c0_i32_1 = arith.constant 0 : i32
    return %c0_i32, %c0_i32_0 : i32, i32
  }
  func.func @transform_9(%arg0: i32) -> (i32, i32) {
    %c0_i32 = arith.constant 0 : i32
    %c0_i32_0 = arith.constant 0 : i32
    %c0_i32_1 = arith.constant 0 : i32
    return %c0_i32, %c0_i32_0 : i32, i32
  }
  func.func @transform_10(%arg0: i32) -> (i32, i32) {
    %c0_i32 = arith.constant 0 : i32
    %c0_i32_0 = arith.constant 0 : i32
    %c0_i32_1 = arith.constant 0 : i32
    return %c0_i32, %c0_i32_0 : i32, i32
  }
  func.func @transform_11(%arg0: i32) -> (i32, i32) {
    %c0_i32 = arith.constant 0 : i32
    %c0_i32_0 = arith.constant 0 : i32
    %c0_i32_1 = arith.constant 0 : i32
    return %c0_i32, %c0_i32_0 : i32, i32
  }
  func.func @transform_12(%arg0: i32) -> (i32, i32, i32) {
    %c0_i32 = arith.constant 0 : i32
    %c0_i32_0 = arith.constant 0 : i32
    %c0_i32_1 = arith.constant 0 : i32
    return %arg0, %c0_i32, %c0_i32_0 : i32, i32, i32
  }
}

</mosaic_0001>

<bundles_post_ra>
// kernel: squeeze.6
= control target key start
LH: loop header
LB: loop body
LE: loop exit
PB: predicated region body
PF: predicated region fallthrough
CT: control target
= control target key end

     0   :  { %vm16_vm0 = vcmask 130048   ;;  %s61_s0 = inlined_call_operand.vmem [shape: f32[16,3,3], index: 0, kind: input, shape index: {}]   ;;  %s62_s1 = inlined_call_operand.vmem [shape: f32[16,9], index: 1, kind: output, shape index: {}]  }
   0x1   :  { %v29_v0 = vld [vmem:[%s61_s0 + $0x8] sm:$0xf]  ;;  %v30_v1 = vld [vmem:[%s61_s0 + $0x4] sm:$0xf]  ;;  %v13_v2 = vld [vmem:[%s61_s0] sm:$0xf] }
   0x2   :  { %8 = vst [vmem:[#allocation0 + $0x10] sm:$0xf] %v29_v0  ;;  %12 = vst [vmem:[#allocation0 + $0x8] sm:$0xf] %v30_v1 }
   0x3   :  { %14 = vst [vmem:[#allocation0] sm:$0xf] %v13_v2 }
   0x9   :  { %v19_v4 = vld [vmem:[#allocation0 + $0x8] sm:$0x7]   ;;  %v24_v5 = vld [vmem:[#allocation0 + $0x10] sm:$0x7]  }
   0xa   :  { %v15_v3 = vld [vmem:[#allocation0] sm:$0x7]   ;;  %31 = vst.msk [vmem:[%s62_s1 + $0x3] sm:$0x7] %vm16_vm0, %v19_v4   ;;  %32 = vst.msk [vmem:[%s62_s1 + $0x6] sm:$0x7] %vm16_vm0, %v24_v5  }
   0xb   :  { %17 = vst.msk [vmem:[%s62_s1] sm:$0x7] %vm16_vm0, %v15_v3  }

// kernel: tcn_model_forward.1
= control target key start
LH: loop header
LB: loop body
LE: loop exit
PB: predicated region body
PF: predicated region fallthrough
CT: control target
= control target key end

     0   :  { %s5883_s0 = inlined_call_operand.vmem [shape: f32[2,16,1536], index: 0, kind: input, shape index: {}]   ;;  %s5884_s1 = inlined_call_operand.vmem [shape: f32[16,16], index: 1, kind: input, shape index: {}]   ;;  %s5885_s2 = inlined_call_operand.vmem [shape: f32[16,1], index: 2, kind: input, shape index: {}]   ;;  %s5886_s3 = inlined_call_operand.vmem [shape: f32[9,16,16], index: 3, kind: input, shape index: {}]   ;;  %s5887_s4 = inlined_call_operand.vmem [shape: f32[16,1], index: 4, kind: input, shape index: {}]   ;;  %s5888_s5 = inlined_call_operand.vmem [shape: f32[414,128], index: 5, kind: input, shape index: {}]   ;;  %s5889_s6 = inlined_call_operand.vmem [shape: f32[8,16,16], index: 6, kind: input, shape index: {}]   ;;  %s5890_s7 = inlined_call_operand.vmem [shape: f32[16,1], index: 7, kind: input, shape index: {}]   ;;  %s5891_s8 = inlined_call_operand.vmem [shape: f32[16,16], index: 8, kind: input, shape index: {}]   ;;  %s5892_s9 = inlined_call_operand.vmem [shape: f32[16,1], index: 9, kind: input, shape index: {}]   ;;  %s5893_s10 = inlined_call_operand.vmem [shape: f32[16,1], index: 10, kind: input, shape index: {}]   ;;  %s5894_s11 = inlined_call_operand.<no memory space> [shape: f32[1,1], index: 11, kind: input, shape index: {}]   ;;  %s5895_s12 = inlined_call_operand.hbm [shape: f32[2,1,16], index: 12, kind: output, shape index: {}]  }
   0x1   :  { %5900 = sst [smem:[#allocation7_spill]] %s5883_s0  ;;  %v17_v0 = vstv %s5894_s11 }
   0x2   :  { %18 = vst [vmem:[#allocation3] sm:$0x1] %v17_v0 }
   0x3   :  { %19 = vsyncpa [#allocation5], 0 }
   0x4   :  { %21 = vsyncpa [#allocation5 + $0x1], 0  ;;  %s5122_s23 = smov 0   ;;  %s5124_s24 = smov 0  }
   0x5   :  { %s5126_s25 = smov 0   ;;  %s5128_s26 = smov 0  }
   0x6 LB: > { %s5143_s11 = sadd.s32 4294967295, %s5031_s26   ;;  %s4121_s27 = sadd.s32 4294967294, %s5031_s26   ;;  %s5031_s26 = sphi %s5128_s26, %s5909_s26   ;;  %s5027_s25 = sphi %s5126_s25, %s5908_s25   ;;  %s5023_s24 = sphi %s5124_s24, %s5907_s24   ;;  %s5019_s23 = sphi %s5122_s23, %s5906_s23  }
   0x7   : > { %s5147_s28 = sadd.s32 1, %s5031_s26   ;;  %s291_s29 = sadd.s32 1, %s5027_s25 }
   0x8   : > { %s288_s30 = ssub.s32 %s5031_s26, %s5147_s28  ;;  %p301_p0 = scmp.ne.s32.totalorder %s5027_s25, %s5023_s24 }
   0x9   : > { %p289_p1 = scmp.eq.s32.totalorder %s288_s30, 0  ;;  %p302_p2 = scmp.eq.s32.totalorder %s5143_s11, 1 }
   0xa   : > { %p307_p3 = scmp.ne.s32.totalorder %s5023_s24, %s5019_s23  ;;  %p308_p4 = scmp.eq.s32.totalorder %s4121_s27, 1 }
   0xb   : > { %s5158_s13 = scalar_select %p289_p1, %s5027_s25, %s291_s29  }
   0xc   : > { %p5160_p5 = por %p302_p2, %p301_p0  ;;  %p5164_p6 = por %p308_p4, %p307_p3 }
   0xd   : > { %p4124_p7 = scmp.ge.s32.totalorder %s5031_s26, 1  ;;  %p367_p8 = scmp.lt.s32.totalorder %s5031_s26, 3 }
   0xf   : > { %p368_p9 = pnand %p4124_p7, %p367_p8 }
  0x10   : > { %p408_p10 = scmp.lt.s32.totalorder (!%p368_p9), %s5143_s11, 1  ;;  %v5033_v1 = vmov (!%p368_p9), 0.0   ;;  %v924_v2 = vld [vmem:[%s5885_s2] sm:$0xff] (!%p368_p9)  ;;  %v5034_v3 = vmov (!%p368_p9), 0   ;;  %v925_v4 = vld [vmem:[%s5885_s2 + $0x8] sm:$0xff] (!%p368_p9)  ;;  %s5903_s0 = sld [smem:[#allocation7_spill]] (!%p368_p9) }
  0x11   : > { %371 = sbr.rel (%p368_p9) target bundleno = 1878 (0x756), region = 68  ;;  %510 = vmatprep.mubr.f32.mxu1 (!%p368_p9), %v5033_v1  ;;  %664 = vmatprep.mubr.f32.mxu0 (!%p368_p9), %v5033_v1  ;;  %v413_v16 = vld [vmem:[%s5884_s1] sm:$0xff] (!%p368_p9)  ;;  %vm439_vm0 = vcmask (!%p368_p9), 130048   ;;  %v414_v33 = vld [vmem:[%s5884_s1 + $0x8] sm:$0xff] (!%p368_p9)  ;;  %vm992_vm1 = vcmask (!%p368_p9), 211968   ;;  %vm995_vm5 = vcmask (!%p368_p9), 703952  }
  0x12   : > { %4714 = vset.pattern.permute.xlu0 (!%p368_p9), %v5034_v3  ;;  %4905 = vset.pattern.permute.xlu1 (!%p368_p9), %v5034_v3  ;;  %993 = vst.msk [vmem:[#allocation2] sm:$0xff] (!%p368_p9), %vm992_vm1, %v5033_v1  ;;  %994 = vst.msk [vmem:[#allocation2 + $0x20] sm:$0xff] (!%p368_p9), %vm992_vm1, %v5033_v1  ;;  %vm1036_vm11 = vcmask (!%p368_p9), 1047760   ;;  %vm1040_vm12 = vcmask (!%p368_p9), 474112   ;;  %s5898_s20 = smov (!%p368_p9), 127   ;;  %s5896_s21 = smov (!%p368_p9), 126  }
  0x13   : > { %928 = vperm.xlu0 (!%p368_p9), %4714, %v924_v2   ;;  %996 = vst.msk [vmem:[#allocation2 + $0x18] sm:$0xff] (!%p368_p9), %vm995_vm5, %v5033_v1  ;;  %997 = vst.msk [vmem:[#allocation2 + $0x38] sm:$0xff] (!%p368_p9), %vm995_vm5, %v5033_v1  ;;  %s5038_s22 = smov (!%p368_p9), 102   ;;  %s5039_s27 = smov (!%p368_p9), 101   ;;  %vm1083_vm13 = vcmask (!%p368_p9), 1039360   ;;  %vm1437_vm14 = vcmask (!%p368_p9), 1031168  }
  0x14   : > { %s5041_s30 = smov (!%p368_p9), 76   ;;  %s5042_s16 = smov (!%p368_p9), 75   ;;  %vm1639_vm15 = vcmask (!%p368_p9), 834560   ;;  %vm2649_vm5 = vcmask (!%p368_p9), 605184  }
  0x15   : > { %s5043_s17 = smov (!%p368_p9), 74  }
  0x17   : > { %933 = vperm.xlu0 (!%p368_p9), %4714, %v925_v4  }
  0x18   : > { %s409_s18 = scalar_select %p408_p10, %s5143_s11, 1 }
  0x1a   : > { %s4654_s19 = smul.u32 192, %s409_s18  ;;  %s5904_s18 = smov 127  }
  0x1c   : > { %s5183_s29 = scalar_lea.vmem %s5903_s0, %s4654_s19  ;;  %s5035_s19 = smov 26  }
  0x1d   : > { %v416_v5 = vld [vmem:[%s5183_s29 + $0x8] sm:$0xff]  ;;  %v415_v10 = vld [vmem:[%s5183_s29] sm:$0xff]  ;;  %v418_v17 = vld [vmem:[%s5183_s29 + $0x18] sm:$0xff] }
  0x1e   : > { %v428_v6 = vld [vmem:[%s5183_s29 + $0x68] sm:$0xff]  ;;  %v427_v11 = vld [vmem:[%s5183_s29 + $0x60] sm:$0xff]  ;;  %v430_v19 = vld [vmem:[%s5183_s29 + $0x78] sm:$0xff] }
  0x1f   : > { %v420_v7 = vld [vmem:[%s5183_s29 + $0x28] sm:$0xff]  ;;  %v4379_v8 = vpack.c.bf16 %v428_v6, %v416_v5  ;;  %v4381_v13 = vpack.c.bf16 %v427_v11, %v415_v10  ;;  %v419_v14 = vld [vmem:[%s5183_s29 + $0x20] sm:$0xff]  ;;  %v4383_v22 = vpack.c.bf16 %v430_v19, %v418_v17  ;;  %v417_v24 = vld [vmem:[%s5183_s29 + $0x10] sm:$0xff] }
  0x20   : > { %v432_v9 = vld [vmem:[%s5183_s29 + $0x88] sm:$0xff]  ;;  %v431_v15 = vld [vmem:[%s5183_s29 + $0x80] sm:$0xff]  ;;  %v429_v25 = vld [vmem:[%s5183_s29 + $0x70] sm:$0xff] }
  0x21   : > { %v4387_v12 = vpack.c.bf16 %v432_v9, %v420_v7  ;;  %4380 = vmatprep.subr.bf16.mxu1 %v4379_v8  ;;  %v4389_v18 = vpack.c.bf16 %v431_v15, %v419_v14  ;;  %v424_v20 = vld [vmem:[%s5183_s29 + $0x48] sm:$0xff]  ;;  %v423_v26 = vld [vmem:[%s5183_s29 + $0x40] sm:$0xff]  ;;  %v4385_v27 = vpack.c.bf16 %v429_v25, %v417_v24  ;;  %v422_v29 = vld [vmem:[%s5183_s29 + $0x38] sm:$0xff] }
  0x22   : > { %v436_v21 = vld [vmem:[%s5183_s29 + $0xa8] sm:$0xff]  ;;  %4382 = vmatpush1.bf16.msra.mxu1 %v4381_v13  ;;  %v435_v28 = vld [vmem:[%s5183_s29 + $0xa0] sm:$0xff]  ;;  %v434_v30 = vld [vmem:[%s5183_s29 + $0x98] sm:$0xff] }
  0x23   : > { %4388 = vmatprep.subr.bf16.mxu0 %v4387_v12  ;;  %v4395_v23 = vpack.c.bf16 %v436_v21, %v424_v20  ;;  %4384 = vmatprep.subr.bf16.mxu1 %v4383_v22  ;;  %v4397_v31 = vpack.c.bf16 %v435_v28, %v423_v26  ;;  %v4391_v32 = vpack.c.bf16 %v434_v30, %v422_v29  ;;  %v421_v34 = vld [vmem:[%s5183_s29 + $0x30] sm:$0xff]  ;;  %v426_v36 = vld [vmem:[%s5183_s29 + $0x58] sm:$0xff] }
  0x24   : > { %4390 = vmatpush1.bf16.msra.mxu0 %v4389_v18  ;;  %v433_v35 = vld [vmem:[%s5183_s29 + $0x90] sm:$0xff]  ;;  %v438_v37 = vld [vmem:[%s5183_s29 + $0xb8] sm:$0xff] }
  0x25   : > { %4396 = vmatprep.subr.bf16.mxu0 %v4395_v23  ;;  %4126 = vmatmul.mubr.msk.f32.vlgmr.msra.gmra.mrb[0].mxu1 %vm439_vm0, %v413_v16  ;;  %v4393_v38 = vpack.c.bf16 %v433_v35, %v421_v34  ;;  %v4399_v39 = vpack.c.bf16 %v438_v37, %v426_v36  ;;  %v425_v40 = vld [vmem:[%s5183_s29 + $0x50] sm:$0xff] }
  0x26   : > { %516 = vmatprep.mubr.f32.mxu1 %v5033_v1  ;;  %4386 = vmatpush1.bf16.msra.mxu1 %v4385_v27  ;;  %v437_v41 = vld [vmem:[%s5183_s29 + $0xb0] sm:$0xff]  ;;  %s5040_s29 = smov 100  }
  0x27   : > { %4130 = vmatmul.mubr.msk.f32.vlgmr.msra.gmra.mrb[0].mxu0 %vm439_vm0, %v413_v16  ;;  %4392 = vmatprep.subr.bf16.mxu1 %v4391_v32  ;;  %v4401_v42 = vpack.c.bf16 %v437_v41, %v425_v40 }
  0x28   : > { %670 = vmatprep.mubr.f32.mxu0 %v5033_v1  ;;  %4398 = vmatpush1.bf16.msra.mxu0 %v4397_v31 }
  0x29   : > { %4127 = vmatmul.mubr.msk.f32.gmra.mrb[2].mxu1 %vm439_vm0, %v414_v33 }
  0x2a   : > { %587 = vmatprep.mubr.f32.mxu1 %v5033_v1 }
  0x2b   : > { %4131 = vmatmul.mubr.msk.f32.gmra.mrb[2].mxu0 %vm439_vm0, %v414_v33 }
  0x2c   : > { %818 = vmatprep.mubr.f32.mxu0 %v5033_v1 }
  0x2d   : > { %4128 = vmatmul.mubr.msk.f32.vlgmr.msra.gmra.mrb[4].mxu1 %vm439_vm0, %v413_v16 }
  0x2e   : > { %593 = vmatprep.mubr.f32.mxu1 %v5033_v1  ;;  %4394 = vmatpush1.bf16.msra.mxu1 %v4393_v38 }
  0x2f   : > { %4134 = vmatmul.mubr.msk.f32.vlgmr.msra.gmra.mrb[4].mxu0 %vm439_vm0, %v413_v16  ;;  %4400 = vmatprep.subr.bf16.mxu1 %v4399_v39 }
  0x30   : > { %824 = vmatprep.mubr.f32.mxu0 %v5033_v1 }
  0x31   : > { %4129 = vmatmul.mubr.msk.f32.gmra.mrb[6].mxu1 %vm439_vm0, %v414_v33 }
  0x32   : > { %741 = vmatprep.mubr.f32.mxu1 %v5033_v1 }
  0x33   : > { %4135 = vmatmul.mubr.msk.f32.gmra.mrb[6].mxu0 %vm439_vm0, %v414_v33 }
  0x34   : > { %1168 = vmatprep.mubr.f32.mxu0 %v5033_v1 }
  0x35   : > { %4132 = vmatmul.mubr.msk.f32.vlgmr.msra.gmra.mrb[8].mxu1 %vm439_vm0, %v413_v16 }
  0x36   : > { %747 = vmatprep.mubr.f32.mxu1 %v5033_v1  ;;  %4402 = vmatpush1.bf16.msra.mxu1 %v4401_v42 }
  0x39   : > { %4133 = vmatmul.mubr.msk.f32.gmra.mrb[10].mxu1 %vm439_vm0, %v414_v33 }
  0x3a   : > { %895 = vmatprep.mubr.f32.mxu1 %v5033_v1 }
  0x3d   : > { %4136 = vmatmul.mubr.msk.f32.vlgmr.msra.gmra.mrb[12].mxu1 %vm439_vm0, %v413_v16 }
  0x3e   : > { %901 = vmatprep.mubr.f32.mxu1 %v5033_v1 }
  0x41   : > { %4137 = vmatmul.mubr.msk.f32.gmra.mrb[14].mxu1 %vm439_vm0, %v414_v33 }
  0x42   : > { %1245 = vmatprep.mubr.f32.mxu1 %v5033_v1 }
  0x92   : > { %v929_v54 = vpop.permute.xlu0 %928 }
  0x96   : > { %v934_v63 = vpop.permute.xlu0 %933 }
  0xf8   : > { %v512_v43 = vpop.f32.mrb[0].mxu1 }
  0xf9   : > { %v514_v45 = vpop.f32.mrb[1].mxu1 }
  0xfa   : > { %v666_v44 = vpop.f32.mrb[0].mxu0 }
  0xfb   : > { %v908_v46 = vmax.f32 %v512_v43, %v666_v44  ;;  %v668_v47 = vpop.f32.mrb[1].mxu0 }
  0xfc   : > { %v909_v48 = vmax.f32 %v514_v45, %v668_v47  ;;  %v518_v49 = vpop.f32.mrb[2].mxu1 }
  0xfd   : > { %v520_v51 = vpop.f32.mrb[3].mxu1 }
  0xfe   : > { %v672_v50 = vpop.f32.mrb[2].mxu0 }
  0xff   : > { %v912_v52 = vmax.f32 %v518_v49, %v672_v50  ;;  %v674_v53 = vpop.f32.mrb[3].mxu0 }
 0x100   : > { %v913_v55 = vmax.f32 %v520_v51, %v674_v53  ;;  %v589_v56 = vpop.f32.mrb[4].mxu1 }
 0x101   : > { %v591_v58 = vpop.f32.mrb[5].mxu1 }
 0x102   : > { %v820_v57 = vpop.f32.mrb[4].mxu0 }
 0x103   : > { %v916_v59 = vmax.f32 %v908_v46, %v820_v57  ;;  %v822_v60 = vpop.f32.mrb[5].mxu0 }
 0x104   : > { %v917_v61 = vmax.f32 %v909_v48, %v822_v60  ;;  %v595_v62 = vpop.f32.mrb[6].mxu1 }
 0x105   : > { %v936_v0 = vadd.f32 %v929_v54, %v916_v59  ;;  %v597_v4 = vpop.f32.mrb[7].mxu1 }
 0x106   : > { %v5243_v2 = vadd.f32 %v929_v54, %v917_v61  ;;  %v826_v3 = vpop.f32.mrb[6].mxu0 }
 0x107   : > { %v920_v5 = vmax.f32 %v912_v52, %v826_v3  ;;  %v828_v6 = vpop.f32.mrb[7].mxu0  ;;  %v952_v7 = vmin.f32 %v936_v0, 0.0  ;;  %vm944_vm2 = vcmp.gt.f32.partialorder %v936_v0, 0.0 }
 0x108   : > { %v921_v8 = vmax.f32 %v913_v55, %v828_v6  ;;  %v953_v9 = vmin.f32 %v5243_v2, 0.0  ;;  %v743_v11 = vpop.f32.mrb[8].mxu1  ;;  %vm945_vm3 = vcmp.gt.f32.partialorder %v5243_v2, 0.0 }
 0x109   : > { %v5246_v10 = vadd.f32 %v934_v63, %v920_v5  ;;  %v960_v12 = vmul.f32 1.442695, %v952_v7  ;;  %v910_v14 = vmax.f32 %v589_v56, %v743_v11  ;;  %v745_v15 = vpop.f32.mrb[9].mxu1 }
 0x10a   : > { %v941_v13 = vadd.f32 %v934_v63, %v921_v8  ;;  %v962_v16 = vmul.f32 1.442695, %v953_v9  ;;  %v911_v17 = vmax.f32 %v591_v58, %v745_v15 }
 0x10b   : > { %4941 = vpow2.f32 %v960_v12  ;;  %v956_v18 = vmin.f32 %v5246_v10, 0.0  ;;  %vm948_vm6 = vcmp.gt.f32.partialorder %v5246_v10, 0.0 }
 0x10c   : > { %4943 = vpow2.f32 %v962_v16  ;;  %v957_v19 = vmin.f32 %v941_v13, 0.0  ;;  %v749_v20 = vpop.f32.mrb[10].mxu1  ;;  %vm949_vm4 = vcmp.gt.f32.partialorder %v941_v13, 0.0 }
 0x10d   : > { %v968_v21 = vmul.f32 1.442695, %v956_v18  ;;  %v914_v22 = vmax.f32 %v595_v62, %v749_v20  ;;  %v751_v23 = vpop.f32.mrb[11].mxu1 }
 0x10e   : > { %v970_v24 = vmul.f32 1.442695, %v957_v19  ;;  %v915_v25 = vmax.f32 %v597_v4, %v751_v23 }
 0x10f   : > { %4945 = vpow2.f32 %v968_v21 }
 0x110   : > { %4947 = vpow2.f32 %v970_v24  ;;  %v897_v26 = vpop.f32.mrb[12].mxu1 }
 0x111   : > { %v918_v27 = vmax.f32 %v910_v14, %v897_v26  ;;  %v899_v28 = vpop.f32.mrb[13].mxu1 }
 0x112   : > { %v919_v29 = vmax.f32 %v911_v17, %v899_v28 }
 0x113   : > { %v938_v30 = vadd.f32 %v929_v54, %v918_v27 }
 0x114   : > { %v939_v32 = vadd.f32 %v929_v54, %v919_v29  ;;  %v903_v33 = vpop.f32.mrb[14].mxu1 }
 0x115   : > { %v4942_v31 = vpop.eup %4941  ;;  %v954_v35 = vmin.f32 %v938_v30, 0.0  ;;  %v922_v36 = vmax.f32 %v914_v22, %v903_v33  ;;  %v905_v37 = vpop.f32.mrb[15].mxu1  ;;  %vm946_vm7 = vcmp.gt.f32.partialorder %v938_v30, 0.0 }
 0x116   : > { %v4944_v34 = vpop.eup %4943  ;;  %v4138_v38 = vadd.f32 -1.0, %v4942_v31  ;;  %v955_v39 = vmin.f32 %v939_v32, 0.0  ;;  %v923_v40 = vmax.f32 %v915_v25, %v905_v37  ;;  %vm947_vm8 = vcmp.gt.f32.partialorder %v939_v32, 0.0 }
 0x117   : > { %v964_v41 = vmul.f32 1.442695, %v954_v35  ;;  %v942_v42 = vadd.f32 %v934_v63, %v922_v36  ;;  %v4139_v44 = vadd.f32 -1.0, %v4944_v34 }
 0x118   : > { %v984_v43 = vsel %vm944_vm2, %v936_v0, %v4138_v38  ;;  %v966_v46 = vmul.f32 1.442695, %v955_v39  ;;  %v943_v47 = vadd.f32 %v934_v63, %v923_v40  ;;  %vm2043_vm2 = vcmask 818176  }
 0x119   : > { %v4946_v45 = vpop.eup %4945  ;;  %1006 = vrot.lane.b32.xlu1 %v984_v43, %s5035_s19  ;;  %4949 = vpow2.f32 %v964_v41  ;;  %v958_v49 = vmin.f32 %v942_v42, 0.0  ;;  %v985_v53 = vsel %vm945_vm3, %v5243_v2, %v4139_v44  ;;  %vm950_vm9 = vcmp.gt.f32.partialorder %v942_v42, 0.0 }
 0x11a   : > { %v4948_v48 = vpop.eup %4947  ;;  %4951 = vpow2.f32 %v966_v46  ;;  %v959_v50 = vmin.f32 %v943_v47, 0.0  ;;  %v4142_v54 = vadd.f32 -1.0, %v4946_v45  ;;  %vm951_vm10 = vcmp.gt.f32.partialorder %v943_v47, 0.0 }
 0x11b   : > { %v4143_v51 = vadd.f32 -1.0, %v4948_v48  ;;  %v972_v52 = vmul.f32 1.442695, %v958_v49  ;;  %v4146_v49 = vld [vmem:[%s5886_s3 + $0x10] sm:$0xff]  ;;  %vm2245_vm3 = vcmask 621568  }
 0x11c   : > { %v974_v55 = vmul.f32 1.442695, %v959_v50  ;;  %v988_v57 = vsel %vm948_vm6, %v5246_v10, %v4142_v54  ;;  %vm2987_vm6 = vcmask 1045504  }
 0x11d   : > { %1008 = vrot.lane.b32.xlu1 %v985_v53, %s5035_s19  ;;  %v989_v56 = vsel %vm949_vm4, %v941_v13, %v4143_v51  ;;  %4953 = vpow2.f32 %v972_v52  ;;  %v4147_v51 = vld [vmem:[%s5886_s3 + $0x18] sm:$0xff]  ;;  %vm2447_vm4 = vcmask 613376  }
 0x11e   : > { %1016 = vrot.lane.b32.xlu0 %v989_v56, %s5035_s19  ;;  %4955 = vpow2.f32 %v974_v55 }
 0x121   : > { %1014 = vrot.lane.b32.xlu1 %v988_v57, %s5035_s19 }
 0x123   : > { %v4950_v58 = vpop.eup %4949 }
 0x124   : > { %v4952_v59 = vpop.eup %4951  ;;  %v4140_v60 = vadd.f32 -1.0, %v4950_v58 }
 0x125   : > { %v4141_v62 = vadd.f32 -1.0, %v4952_v59 }
 0x126   : > { %v986_v61 = vsel %vm946_vm7, %v938_v30, %v4140_v60  ;;  %vm5045_vm7 = vmmov 1  }
 0x127   : > { %v4954_v63 = vpop.eup %4953  ;;  %1010 = vrot.lane.b32.xlu0 %v986_v61, %s5035_s19  ;;  %v987_v3 = vsel %vm947_vm8, %v939_v32, %v4141_v62  ;;  %v1046_v62 = vld [vmem:[%s5886_s3] sm:$0xff]  ;;  %vm4536_vm8 = vmpackc.low %vm2987_vm6, %vm5045_vm7 }
 0x128   : > { %v4956_v0 = vpop.eup %4955  ;;  %v4144_v2 = vadd.f32 -1.0, %v4954_v63 }
 0x129   : > { %v4145_v5 = vadd.f32 -1.0, %v4956_v0 }
 0x12a   : > { %v990_v4 = vsel %vm950_vm9, %v942_v42, %v4144_v2  ;;  %vm2980_vm9 = vcmask 244736  }
 0x12b   : > { %1012 = vrot.lane.b32.xlu0 %v987_v3, %s5035_s19  ;;  %1018 = vrot.lane.b32.xlu1 %v990_v4, %s5035_s19  ;;  %v991_v6 = vsel %vm951_vm10, %v943_v47, %v4145_v5 }
 0x12f   : > { %1020 = vrot.lane.b32.xlu1 %v991_v6, %s5035_s19  ;;  %s5905_s19 = smov 126  }
 0x18b   : > { %v1007_v7 = vpop.permute.xlu1 %1006 }
 0x18c   : > { %1037 = vst.msk [vmem:[#allocation2] sm:$0xff] %vm1036_vm11, %v1007_v7 }
 0x18f   : > { %v1009_v8 = vpop.permute.xlu1 %1008 }
 0x190   : > { %v5264_v9 = vsel %vm992_vm1, %v1007_v7, %v1009_v8  ;;  %v1017_v10 = vpop.permute.xlu0 %1016 }
 0x193   : > { %v1015_v11 = vpop.permute.xlu1 %1014  ;;  %v5278_v18 = vld [vmem:[#allocation2] sm:$0xff] }
 0x194   : > { %v5267_v12 = vsel %vm992_vm1, %v1015_v11, %v1017_v10  ;;  %1042 = vst.msk [vmem:[#allocation2 + $0x20] sm:$0xff] %vm1036_vm11, %v1015_v11 }
 0x195   : > { %v4411_v13 = vpack.c.bf16 %v5267_v12, %v5264_v9 }
 0x199   : > { %v1011_v14 = vpop.permute.xlu0 %1010 }
 0x19a   : > { %v5272_v15 = vsel %vm992_vm1, %v1009_v8, %v1011_v14 }
 0x19b   : > { %v5274_v16 = vld [vmem:[#allocation2 + $0x20] sm:$0xff]  ;;  %v4715_v17 = vpack.i.bf16 %v5272_v15, %v5264_v9 }
 0x19c   : > { %v4413_v21 = vpack.c.bf16 %v5274_v16, %v5278_v18  ;;  %v4720_v24 = vpack.i.bf16 %v5274_v16, %v5278_v18 }
 0x19d   : > { %v1013_v19 = vpop.permute.xlu0 %1012  ;;  %v1019_v20 = vpop.permute.xlu1 %1018  ;;  %4716 = vrot.lane.b32.xlu0 %v4715_v17, %s5898_s20 }
 0x19e   : > { %v1024_v22 = vsel %vm992_vm1, %v1011_v14, %v1013_v19  ;;  %v5285_v23 = vsel %vm992_vm1, %v1017_v10, %v1019_v20 }
 0x19f   : > { %1041 = vst.msk [vmem:[#allocation2 + $0x18] sm:$0xff] %vm1040_vm12, %v1024_v22  ;;  %v4725_v25 = vpack.i.bf16 %v5285_v23, %v5267_v12  ;;  %v4417_v26 = vpack.c.bf16 %v5285_v23, %v5272_v15 }
 0x1a1   : > { %v1021_v27 = vpop.permute.xlu1 %1020  ;;  %4721 = vrot.lane.b32.xlu0 %v4720_v24, %s5898_s20  ;;  %4726 = vrot.lane.b32.xlu1 %v4725_v25, %s5898_s20 }
 0x1a2   : > { %v1027_v28 = vsel %vm992_vm1, %v1019_v20, %v1021_v27  ;;  %vm1841_vm1 = vcmask 826368  }
 0x1a3   : > { %1045 = vst.msk [vmem:[#allocation2 + $0x38] sm:$0xff] %vm1040_vm12, %v1027_v28  ;;  %v4156_v28 = vld [vmem:[%s5886_s3 + $0x20] sm:$0xff] }
 0x1a5   : > { %4736 = vrot.lane.b32.xlu0 %v4715_v17, %s5896_s21 }
 0x1a6   : > { %v5300_v29 = vld [vmem:[#allocation2 + $0x18] sm:$0xff] }
 0x1a9   : > { %4746 = vrot.lane.b32.xlu0 %v4720_v24, %s5896_s21 }
 0x1aa   : > { %v5302_v30 = vld [vmem:[#allocation2 + $0x38] sm:$0xff] }
 0x1ab   : > { %v4730_v31 = vpack.i.bf16 %v5302_v30, %v5300_v29  ;;  %v4415_v32 = vpack.c.bf16 %v5302_v30, %v5300_v29 }
 0x1ad   : > { %4731 = vrot.lane.b32.xlu1 %v4730_v31, %s5898_s20  ;;  %4751 = vrot.lane.b32.xlu0 %v4715_v17, %s5038_s22  ;;  %s5048_s20 = smov 64  }
 0x1b1   : > { %4741 = vrot.lane.b32.xlu1 %v4725_v25, %s5896_s21  ;;  %4766 = vrot.lane.b32.xlu0 %v4720_v24, %s5038_s22 }
 0x1b5   : > { %4756 = vrot.lane.b32.xlu1 %v4730_v31, %s5896_s21  ;;  %4771 = vrot.lane.b32.xlu0 %v4715_v17, %s5039_s27  ;;  %s5049_s21 = smov 80  }
 0x1b9   : > { %4761 = vrot.lane.b32.xlu1 %v4725_v25, %s5038_s22  ;;  %4786 = vrot.lane.b32.xlu0 %v4720_v24, %s5039_s27 }
 0x1bd   : > { %4776 = vrot.lane.b32.xlu1 %v4730_v31, %s5038_s22  ;;  %4791 = vrot.lane.b32.xlu0 %v4715_v17, %s5040_s29  ;;  %s4239_s22 = sshll.u32 %s5143_s11, 4  ;;  %s5053_s11 = smov [#allocation4]  }
 0x1c1   : > { %4781 = vrot.lane.b32.xlu1 %v4725_v25, %s5039_s27  ;;  %4806 = vrot.lane.b32.xlu0 %v4720_v24, %s5040_s29 }
 0x1c5   : > { %4796 = vrot.lane.b32.xlu1 %v4730_v31, %s5039_s27  ;;  %4811 = vrot.lane.b32.xlu0 %v4715_v17, %s5041_s30 }
 0x1c9   : > { %4801 = vrot.lane.b32.xlu1 %v4725_v25, %s5040_s29  ;;  %4826 = vrot.lane.b32.xlu0 %v4720_v24, %s5041_s30 }
 0x1cd   : > { %4816 = vrot.lane.b32.xlu1 %v4730_v31, %s5040_s29  ;;  %4831 = vrot.lane.b32.xlu0 %v4715_v17, %s5042_s16  ;;  %s5050_s29 = smov 32  }
 0x1d1   : > { %4821 = vrot.lane.b32.xlu1 %v4725_v25, %s5041_s30  ;;  %4846 = vrot.lane.b32.xlu0 %v4720_v24, %s5042_s16 }
 0x1d5   : > { %4836 = vrot.lane.b32.xlu1 %v4730_v31, %s5041_s30  ;;  %4851 = vrot.lane.b32.xlu0 %v4715_v17, %s5043_s17  ;;  %v1047_v17 = vld [vmem:[%s5886_s3 + $0x8] sm:$0xff]  ;;  %s5051_s30 = smov 48  }
 0x1d9   : > { %4841 = vrot.lane.b32.xlu1 %v4725_v25, %s5042_s16  ;;  %4866 = vrot.lane.b32.xlu0 %v4720_v24, %s5043_s17 }
 0x1dd   : > { %4856 = vrot.lane.b32.xlu1 %v4730_v31, %s5042_s16  ;;  %s5046_s16 = smov 96  }
 0x1e1   : > { %4861 = vrot.lane.b32.xlu1 %v4725_v25, %s5043_s17 }
 0x1e5   : > { %4871 = vrot.lane.b32.xlu1 %v4730_v31, %s5043_s17  ;;  %s5047_s17 = smov 112  }
 0x20f   : > { %v4717_v33 = vpop.permute.xlu0 %4716 }
 0x210   : > { %v4719_v34 = vunpack.i.h.bf16 %v4717_v33  ;;  %v4718_v35 = vunpack.i.l.bf16 %v4717_v33 }
 0x212   : > { %v1085_v44 = vsel %vm1083_vm13, %v4718_v35, %v4719_v34 }
 0x213   : > { %v4722_v36 = vpop.permute.xlu0 %4721  ;;  %v4727_v37 = vpop.permute.xlu1 %4726 }
 0x214   : > { %v4724_v38 = vunpack.i.h.bf16 %v4722_v36  ;;  %v4723_v39 = vunpack.i.l.bf16 %v4722_v36  ;;  %v4729_v40 = vunpack.i.h.bf16 %v4727_v37  ;;  %v4728_v41 = vunpack.i.l.bf16 %v4727_v37 }
 0x216   : > { %v1084_v42 = vsel %vm1083_vm13, %v4723_v39, %v4718_v35  ;;  %v1087_v43 = vsel %vm1083_vm13, %v4724_v38, %v4728_v41  ;;  %v1088_v45 = vsel %vm1083_vm13, %v4728_v41, %v4729_v40 }
 0x217   : > { %v4405_v46 = vpack.c.bf16 %v1087_v43, %v1084_v42  ;;  %v5315_v47 = vpop.permute.xlu0 %4736  ;;  %v4403_v48 = vpack.c.bf16 %v1088_v45, %v1085_v44 }
 0x218   : > { %v4739_v56 = vunpack.i.h.bf16 %v5315_v47  ;;  %v4738_v57 = vunpack.i.l.bf16 %v5315_v47 }
 0x219   : > { %4404 = vmatprep.subr.bf16.mxu0 %v4403_v48 }
 0x21a   : > { %4406 = vmatpush1.bf16.msra.mxu0 %v4405_v46  ;;  %v1439_v6 = vsel %vm1437_vm14, %v4738_v57, %v4739_v56 }
 0x21b   : > { %v4747_v50 = vpop.permute.xlu0 %4746  ;;  %4412 = vmatprep.subr.bf16.mxu0 %v4411_v13 }
 0x21c   : > { %v4748_v61 = vunpack.i.l.bf16 %v4747_v50  ;;  %v4749_v3 = vunpack.i.h.bf16 %v4747_v50 }
 0x21d   : > { %4148 = vmatmul.mubr.msk.f32.vlgmr.msra.gmra.mrb[8].mxu0 %vm439_vm0, %v4146_v49 }
 0x21e   : > { %4414 = vmatpush1.bf16.msra.mxu0 %v4413_v21  ;;  %1174 = vmatprep.mubr.f32.mxu0 %v5033_v1  ;;  %v1438_v7 = vsel %vm1437_vm14, %v4748_v61, %v4738_v57 }
 0x21f   : > { %v4732_v52 = vpop.permute.xlu1 %4731  ;;  %v5331_v53 = vpop.permute.xlu0 %4751 }
 0x220   : > { %v4734_v54 = vunpack.i.h.bf16 %v4732_v52  ;;  %v4733_v55 = vunpack.i.l.bf16 %v4732_v52  ;;  %v4754_v18 = vunpack.i.h.bf16 %v5331_v53  ;;  %v4753_v19 = vunpack.i.l.bf16 %v5331_v53  ;;  %v4162_v52 = vld [vmem:[%s5886_s3 + $0x30] sm:$0xff] }
 0x221   : > { %4149 = vmatmul.mubr.msk.f32.gmra.mrb[10].mxu0 %vm439_vm0, %v4147_v51 }
 0x222   : > { %v1086_v58 = vsel %vm1083_vm13, %v4719_v34, %v4733_v55  ;;  %v1089_v59 = vsel %vm1083_vm13, %v4729_v40, %v4734_v54  ;;  %v4407_v60 = vpack.c.bf16 %v4734_v54, %v4733_v55  ;;  %1328 = vmatprep.mubr.f32.mxu0 %v5033_v1  ;;  %v1641_v31 = vsel %vm1639_vm15, %v4753_v19, %v4754_v18  ;;  %v4157_v40 = vld [vmem:[%s5886_s3 + $0x28] sm:$0xff] }
 0x223   : > { %v4409_v63 = vpack.c.bf16 %v1089_v59, %v1086_v58  ;;  %v4742_v0 = vpop.permute.xlu1 %4741  ;;  %v4767_v2 = vpop.permute.xlu0 %4766 }
 0x224   : > { %v4744_v4 = vunpack.i.h.bf16 %v4742_v0  ;;  %v4743_v5 = vunpack.i.l.bf16 %v4742_v0  ;;  %4408 = vmatprep.subr.bf16.mxu1 %v4407_v60  ;;  %v4768_v21 = vunpack.i.l.bf16 %v4767_v2  ;;  %v4769_v22 = vunpack.i.h.bf16 %v4767_v2  ;;  %v4163_v0 = vld [vmem:[%s5886_s3 + $0x38] sm:$0xff] }
 0x225   : > { %4410 = vmatpush1.bf16.msra.mxu1 %v4409_v63  ;;  %4152 = vmatmul.mubr.msk.f32.vlgmr.msra.gmra.mrb[8].mxu0 %vm439_vm0, %v1046_v62 }
 0x226   : > { %v1441_v8 = vsel %vm1437_vm14, %v4749_v3, %v4743_v5  ;;  %4416 = vmatprep.subr.bf16.mxu1 %v4415_v32  ;;  %v1442_v9 = vsel %vm1437_vm14, %v4743_v5, %v4744_v4  ;;  %1334 = vmatprep.mubr.f32.mxu0 %v5033_v1  ;;  %v1640_v29 = vsel %vm1639_vm15, %v4768_v21, %v4753_v19 }
 0x227   : > { %v4421_v10 = vpack.c.bf16 %v1441_v8, %v1438_v7  ;;  %v4757_v11 = vpop.permute.xlu1 %4756  ;;  %v4419_v12 = vpack.c.bf16 %v1442_v9, %v1439_v6  ;;  %v5351_v13 = vpop.permute.xlu0 %4771 }
 0x228   : > { %v4759_v14 = vunpack.i.h.bf16 %v4757_v11  ;;  %v4758_v16 = vunpack.i.l.bf16 %v4757_v11  ;;  %4150 = vmatmul.mubr.msk.f32.vlgmr.msra.gmra.mrb[16].mxu1 %vm439_vm0, %v4146_v49  ;;  %v4774_v41 = vunpack.i.h.bf16 %v5351_v13  ;;  %v4773_v42 = vunpack.i.l.bf16 %v5351_v13  ;;  %v4168_v13 = vld [vmem:[%s5886_s3 + $0x40] sm:$0xff] }
 0x229   : > { %4418 = vmatpush1.bf16.msra.mxu1 %v4417_v26  ;;  %4420 = vmatprep.subr.bf16.mxu0 %v4419_v12 }
 0x22a   : > { %v4423_v20 = vpack.c.bf16 %v4759_v14, %v4758_v16  ;;  %1251 = vmatprep.mubr.f32.mxu1 %v5033_v1  ;;  %4422 = vmatpush1.bf16.msra.mxu0 %v4421_v10  ;;  %v1440_v27 = vsel %vm1437_vm14, %v4739_v56, %v4758_v16  ;;  %v1443_v15 = vsel %vm1437_vm14, %v4744_v4, %v4759_v14 }
 0x22b   : > { %v4762_v24 = vpop.permute.xlu1 %4761  ;;  %4153 = vmatmul.mubr.msk.f32.gmra.mrb[10].mxu0 %vm439_vm0, %v1047_v17  ;;  %v4787_v25 = vpop.permute.xlu0 %4786  ;;  %v4425_v33 = vpack.c.bf16 %v1443_v15, %v1440_v27  ;;  %v1843_v55 = vsel %vm1841_vm1, %v4773_v42, %v4774_v41  ;;  %v4169_v15 = vld [vmem:[%s5886_s3 + $0x48] sm:$0xff] }
 0x22c   : > { %v4764_v23 = vunpack.i.h.bf16 %v4762_v24  ;;  %v4763_v26 = vunpack.i.l.bf16 %v4762_v24  ;;  %4151 = vmatmul.mubr.msk.f32.gmra.mrb[18].mxu1 %vm439_vm0, %v4147_v51  ;;  %4424 = vmatprep.subr.bf16.mxu1 %v4423_v20  ;;  %v4788_v44 = vunpack.i.l.bf16 %v4787_v25  ;;  %v4789_v45 = vunpack.i.h.bf16 %v4787_v25 }
 0x22d   : > { %1405 = vmatprep.mubr.f32.mxu1 %v5033_v1  ;;  %1522 = vmatprep.mubr.f32.mxu0 %v5033_v1 }
 0x22e   : > { %v1643_v30 = vsel %vm1639_vm15, %v4769_v22, %v4763_v26  ;;  %v1644_v32 = vsel %vm1639_vm15, %v4763_v26, %v4764_v23  ;;  %v1842_v53 = vsel %vm1841_vm1, %v4788_v44, %v4773_v42 }
 0x22f   : > { %v4429_v34 = vpack.c.bf16 %v1643_v30, %v1640_v29  ;;  %v4777_v35 = vpop.permute.xlu1 %4776  ;;  %v4427_v36 = vpack.c.bf16 %v1644_v32, %v1641_v31  ;;  %4158 = vmatmul.mubr.msk.f32.vlgmr.msra.gmra.mrb[8].mxu0 %vm439_vm0, %v4156_v28  ;;  %v5377_v37 = vpop.permute.xlu0 %4791 }
 0x230   : > { %v4779_v38 = vunpack.i.h.bf16 %v4777_v35  ;;  %v4778_v39 = vunpack.i.l.bf16 %v4777_v35  ;;  %4154 = vmatmul.mubr.msk.f32.vlgmr.msra.gmra.mrb[16].mxu1 %vm439_vm0, %v1046_v62  ;;  %1528 = vmatprep.mubr.f32.mxu0 %v5033_v1  ;;  %v4794_v2 = vunpack.i.h.bf16 %v5377_v37  ;;  %v4793_v3 = vunpack.i.l.bf16 %v5377_v37  ;;  %v4174_v37 = vld [vmem:[%s5886_s3 + $0x50] sm:$0xff] }
 0x231   : > { %4426 = vmatpush1.bf16.msra.mxu1 %v4425_v33  ;;  %4428 = vmatprep.subr.bf16.mxu0 %v4427_v36 }
 0x232   : > { %v4431_v43 = vpack.c.bf16 %v4779_v38, %v4778_v39  ;;  %1411 = vmatprep.mubr.f32.mxu1 %v5033_v1  ;;  %4430 = vmatpush1.bf16.msra.mxu0 %v4429_v34  ;;  %v1642_v48 = vsel %vm1639_vm15, %v4754_v18, %v4778_v39  ;;  %v1645_v49 = vsel %vm1639_vm15, %v4764_v23, %v4779_v38 }
 0x233   : > { %v4782_v46 = vpop.permute.xlu1 %4781  ;;  %4159 = vmatmul.mubr.msk.f32.gmra.mrb[10].mxu0 %vm439_vm0, %v4157_v40  ;;  %v4807_v47 = vpop.permute.xlu0 %4806  ;;  %v4433_v57 = vpack.c.bf16 %v1645_v49, %v1642_v48  ;;  %v4175_v48 = vld [vmem:[%s5886_s3 + $0x58] sm:$0xff] }
 0x234   : > { %v4784_v50 = vunpack.i.h.bf16 %v4782_v46  ;;  %v4783_v51 = vunpack.i.l.bf16 %v4782_v46  ;;  %4155 = vmatmul.mubr.msk.f32.gmra.mrb[18].mxu1 %vm439_vm0, %v1047_v17  ;;  %4432 = vmatprep.subr.bf16.mxu1 %v4431_v43  ;;  %v4808_v5 = vunpack.i.l.bf16 %v4807_v47  ;;  %v4809_v6 = vunpack.i.h.bf16 %v4807_v47 }
 0x235   : > { %1599 = vmatprep.mubr.f32.mxu1 %v5033_v1  ;;  %1724 = vmatprep.mubr.f32.mxu0 %v5033_v1  ;;  %v2045_v17 = vsel %vm2043_vm2, %v4793_v3, %v4794_v2 }
 0x236   : > { %v1845_v54 = vsel %vm1841_vm1, %v4789_v45, %v4783_v51  ;;  %v1846_v56 = vsel %vm1841_vm1, %v4783_v51, %v4784_v50  ;;  %v2044_v14 = vsel %vm2043_vm2, %v4808_v5, %v4793_v3 }
 0x237   : > { %v4437_v58 = vpack.c.bf16 %v1845_v54, %v1842_v53  ;;  %v4797_v59 = vpop.permute.xlu1 %4796  ;;  %v4435_v60 = vpack.c.bf16 %v1846_v56, %v1843_v55  ;;  %4164 = vmatmul.mubr.msk.f32.vlgmr.msra.gmra.mrb[8].mxu0 %vm439_vm0, %v4162_v52  ;;  %v5401_v61 = vpop.permute.xlu0 %4811 }
 0x238   : > { %v4799_v62 = vunpack.i.h.bf16 %v4797_v59  ;;  %v4798_v63 = vunpack.i.l.bf16 %v4797_v59  ;;  %4160 = vmatmul.mubr.msk.f32.vlgmr.msra.gmra.mrb[16].mxu1 %vm439_vm0, %v4156_v28  ;;  %1730 = vmatprep.mubr.f32.mxu0 %v5033_v1  ;;  %v4814_v23 = vunpack.i.h.bf16 %v5401_v61  ;;  %v4813_v26 = vunpack.i.l.bf16 %v5401_v61 }
 0x239   : > { %4434 = vmatpush1.bf16.msra.mxu1 %v4433_v57  ;;  %4436 = vmatprep.subr.bf16.mxu0 %v4435_v60  ;;  %v4180_v60 = vld [vmem:[%s5886_s3 + $0x60] sm:$0xff] }
 0x23a   : > { %v4439_v4 = vpack.c.bf16 %v4799_v62, %v4798_v63  ;;  %1605 = vmatprep.mubr.f32.mxu1 %v5033_v1  ;;  %4438 = vmatpush1.bf16.msra.mxu0 %v4437_v58  ;;  %v1844_v9 = vsel %vm1841_vm1, %v4774_v41, %v4798_v63  ;;  %v1847_v10 = vsel %vm1841_vm1, %v4784_v50, %v4799_v62  ;;  %vm4051_vm1 = vcmask 122880  }
 0x23b   : > { %v4802_v7 = vpop.permute.xlu1 %4801  ;;  %4165 = vmatmul.mubr.msk.f32.gmra.mrb[10].mxu0 %vm439_vm0, %v4163_v0  ;;  %v4827_v8 = vpop.permute.xlu0 %4826  ;;  %v4441_v19 = vpack.c.bf16 %v1847_v10, %v1844_v9  ;;  %v4181_v9 = vld [vmem:[%s5886_s3 + $0x68] sm:$0xff] }
 0x23c   : > { %v4804_v11 = vunpack.i.h.bf16 %v4802_v7  ;;  %v4803_v12 = vunpack.i.l.bf16 %v4802_v7  ;;  %4161 = vmatmul.mubr.msk.f32.gmra.mrb[18].mxu1 %vm439_vm0, %v4157_v40  ;;  %4440 = vmatprep.subr.bf16.mxu1 %v4439_v4  ;;  %v4828_v29 = vunpack.i.l.bf16 %v4827_v8  ;;  %v4829_v30 = vunpack.i.h.bf16 %v4827_v8 }
 0x23d   : > { %1801 = vmatprep.mubr.f32.mxu1 %v5033_v1  ;;  %1926 = vmatprep.mubr.f32.mxu0 %v5033_v1  ;;  %v2247_v40 = vsel %vm2245_vm3, %v4813_v26, %v4814_v23 }
 0x23e   : > { %v2047_v16 = vsel %vm2043_vm2, %v4809_v6, %v4803_v12  ;;  %v2048_v18 = vsel %vm2043_vm2, %v4803_v12, %v4804_v11  ;;  %v2246_v38 = vsel %vm2245_vm3, %v4828_v29, %v4813_v26 }
 0x23f   : > { %v4445_v20 = vpack.c.bf16 %v2047_v16, %v2044_v14  ;;  %v4817_v21 = vpop.permute.xlu1 %4816  ;;  %v4443_v22 = vpack.c.bf16 %v2048_v18, %v2045_v17  ;;  %4170 = vmatmul.mubr.msk.f32.vlgmr.msra.gmra.mrb[8].mxu0 %vm439_vm0, %v4168_v13  ;;  %v5425_v24 = vpop.permute.xlu0 %4831 }
 0x240   : > { %v4819_v25 = vunpack.i.h.bf16 %v4817_v21  ;;  %v4818_v27 = vunpack.i.l.bf16 %v4817_v21  ;;  %4166 = vmatmul.mubr.msk.f32.vlgmr.msra.gmra.mrb[16].mxu1 %vm439_vm0, %v4162_v52  ;;  %1932 = vmatprep.mubr.f32.mxu0 %v5033_v1  ;;  %v4834_v50 = vunpack.i.h.bf16 %v5425_v24  ;;  %v4833_v51 = vunpack.i.l.bf16 %v5425_v24  ;;  %v4186_v21 = vld [vmem:[%s5886_s3 + $0x70] sm:$0xff] }
 0x241   : > { %4442 = vmatpush1.bf16.msra.mxu1 %v4441_v19  ;;  %4444 = vmatprep.subr.bf16.mxu0 %v4443_v22 }
 0x242   : > { %v4447_v28 = vpack.c.bf16 %v4819_v25, %v4818_v27  ;;  %1807 = vmatprep.mubr.f32.mxu1 %v5033_v1  ;;  %4446 = vmatpush1.bf16.msra.mxu0 %v4445_v20  ;;  %v2046_v33 = vsel %vm2043_vm2, %v4794_v2, %v4818_v27  ;;  %v2049_v34 = vsel %vm2043_vm2, %v4804_v11, %v4819_v25 }
 0x243   : > { %v4822_v31 = vpop.permute.xlu1 %4821  ;;  %4171 = vmatmul.mubr.msk.f32.gmra.mrb[10].mxu0 %vm439_vm0, %v4169_v15  ;;  %v4847_v32 = vpop.permute.xlu0 %4846  ;;  %v4449_v42 = vpack.c.bf16 %v2049_v34, %v2046_v33  ;;  %v2449_v63 = vsel %vm2447_vm4, %v4833_v51, %v4834_v50 }
 0x244   : > { %v4824_v35 = vunpack.i.h.bf16 %v4822_v31  ;;  %v4823_v36 = vunpack.i.l.bf16 %v4822_v31  ;;  %4167 = vmatmul.mubr.msk.f32.gmra.mrb[18].mxu1 %vm439_vm0, %v4163_v0  ;;  %4448 = vmatprep.subr.bf16.mxu1 %v4447_v28  ;;  %v4848_v53 = vunpack.i.l.bf16 %v4847_v32  ;;  %v4849_v54 = vunpack.i.h.bf16 %v4847_v32  ;;  %v4187_v31 = vld [vmem:[%s5886_s3 + $0x78] sm:$0xff] }
 0x245   : > { %2003 = vmatprep.mubr.f32.mxu1 %v5033_v1  ;;  %2128 = vmatprep.mubr.f32.mxu0 %v5033_v1 }
 0x246   : > { %v2249_v39 = vsel %vm2245_vm3, %v4829_v30, %v4823_v36  ;;  %v2250_v41 = vsel %vm2245_vm3, %v4823_v36, %v4824_v35  ;;  %v2448_v61 = vsel %vm2447_vm4, %v4848_v53, %v4833_v51  ;;  %v2935_v51 = vld [vmem:[%s5888_s5 + $0x98] sm:$0xff] }
 0x247   : > { %v4453_v43 = vpack.c.bf16 %v2249_v39, %v2246_v38  ;;  %v4837_v44 = vpop.permute.xlu1 %4836  ;;  %v4451_v45 = vpack.c.bf16 %v2250_v41, %v2247_v40  ;;  %4176 = vmatmul.mubr.msk.f32.vlgmr.msra.gmra.mrb[8].mxu0 %vm439_vm0, %v4174_v37  ;;  %v5454_v49 = vpop.permute.xlu0 %4851  ;;  %v2948_v38 = vld [vmem:[%s5888_s5 + $0x100] sm:$0xff]  ;;  %v2949_v39 = vld [vmem:[%s5888_s5 + $0x108] sm:$0xff]  ;;  %v5044_v41 = vmov 0.0|0.0   ;;  %v2919_v53 = vld [vmem:[%s5888_s5 + $0x18] sm:$0xff] }
 0x248   : > { %v4839_v46 = vunpack.i.h.bf16 %v4837_v44  ;;  %v4838_v47 = vunpack.i.l.bf16 %v4837_v44  ;;  %4172 = vmatmul.mubr.msk.f32.vlgmr.msra.gmra.mrb[16].mxu1 %vm439_vm0, %v4168_v13  ;;  %2134 = vmatprep.mubr.f32.mxu0 %v5033_v1  ;;  %v4854_v10 = vunpack.i.h.bf16 %v5454_v49  ;;  %v4853_v11 = vunpack.i.l.bf16 %v5454_v49  ;;  %v2932_v40 = vld [vmem:[%s5888_s5 + $0x80] sm:$0xff]  ;;  %v2917_v44 = vld [vmem:[%s5888_s5 + $0x8] sm:$0xff]  ;;  %v2934_v49 = vld [vmem:[%s5888_s5 + $0x90] sm:$0xff] }
 0x249   : > { %4450 = vmatpush1.bf16.msra.mxu1 %v4449_v42  ;;  %4452 = vmatprep.subr.bf16.mxu0 %v4451_v45  ;;  %v4508_v42 = vpack.c.bf16 %v2949_v39, %v2948_v38  ;;  %v2945_v38 = vld [vmem:[%s5888_s5 + $0xe8] sm:$0xff]  ;;  %v2964_v39 = vld [vmem:[%s5888_s5 + $0x180] sm:$0xff] }
 0x24a   : > { %v4455_v52 = vpack.c.bf16 %v4839_v46, %v4838_v47  ;;  %2009 = vmatprep.mubr.f32.mxu1 %v5033_v1  ;;  %4454 = vmatpush1.bf16.msra.mxu0 %v4453_v43  ;;  %v2248_v56 = vsel %vm2245_vm3, %v4814_v23, %v4838_v47  ;;  %v2251_v57 = vsel %vm2245_vm3, %v4824_v35, %v4839_v46  ;;  %v4192_v35 = vld [vmem:[%s5886_s3 + $0x80] sm:$0xff]  ;;  %v2950_v47 = vld [vmem:[%s5888_s5 + $0x110] sm:$0xff] }
 0x24b   : > { %v4842_v55 = vpop.permute.xlu1 %4841  ;;  %4177 = vmatmul.mubr.msk.f32.gmra.mrb[10].mxu0 %vm439_vm0, %v4175_v48  ;;  %v4457_v2 = vpack.c.bf16 %v2251_v57, %v2248_v56  ;;  %v4867_v6 = vpop.permute.xlu0 %4866  ;;  %v2651_v25 = vsel %vm2649_vm5, %v4853_v11, %v4854_v10  ;;  %v2916_v43 = vld [vmem:[%s5888_s5] sm:$0xff]  ;;  %v2953_v56 = vld [vmem:[%s5888_s5 + $0x128] sm:$0xff] }
 0x24c   : > { %v4844_v58 = vunpack.i.h.bf16 %v4842_v55  ;;  %v4843_v59 = vunpack.i.l.bf16 %v4842_v55  ;;  %4173 = vmatmul.mubr.msk.f32.gmra.mrb[18].mxu1 %vm439_vm0, %v4169_v15  ;;  %4456 = vmatprep.subr.bf16.mxu1 %v4455_v52  ;;  %v4868_v13 = vunpack.i.l.bf16 %v4867_v6  ;;  %v4869_v14 = vunpack.i.h.bf16 %v4867_v6  ;;  %v2918_v52 = vld [vmem:[%s5888_s5 + $0x10] sm:$0xff]  ;;  %v2952_v55 = vld [vmem:[%s5888_s5 + $0x120] sm:$0xff] }
 0x24d   : > { %2205 = vmatprep.mubr.f32.mxu1 %v5033_v1  ;;  %2330 = vmatprep.mubr.f32.mxu0 %v5033_v1  ;;  %v4477_v46 = vpack.c.bf16 %v2917_v44, %v2916_v43  ;;  %v2936_v57 = vld [vmem:[%s5888_s5 + $0xa0] sm:$0xff]  ;;  %v2965_v43 = vld [vmem:[%s5888_s5 + $0x188] sm:$0xff] }
 0x24e   : > { %v2451_v62 = vsel %vm2447_vm4, %v4849_v54, %v4843_v59  ;;  %v2452_v0 = vsel %vm2447_vm4, %v4843_v59, %v4844_v58  ;;  %v2650_v22 = vsel %vm2649_vm5, %v4868_v13, %v4853_v11  ;;  %v4479_v54 = vpack.c.bf16 %v2935_v51, %v2934_v49  ;;  %v2937_v59 = vld [vmem:[%s5888_s5 + $0xa8] sm:$0xff]  ;;  %v2947_v49 = vld [vmem:[%s5888_s5 + $0xf8] sm:$0xff] }
 0x24f   : > { %v4461_v3 = vpack.c.bf16 %v2451_v62, %v2448_v61  ;;  %v4857_v4 = vpop.permute.xlu1 %4856  ;;  %v4459_v5 = vpack.c.bf16 %v2452_v0, %v2449_v63  ;;  %4182 = vmatmul.mubr.msk.f32.vlgmr.msra.gmra.mrb[8].mxu0 %vm439_vm0, %v4180_v60  ;;  %v2920_v61 = vld [vmem:[%s5888_s5 + $0x20] sm:$0xff]  ;;  %v2921_v62 = vld [vmem:[%s5888_s5 + $0x28] sm:$0xff]  ;;  %v4514_v63 = vpack.c.bf16 %v2953_v56, %v2952_v55  ;;  %v2938_v0 = vld [vmem:[%s5888_s5 + $0xb0] sm:$0xff] }
 0x250   : > { %v4859_v7 = vunpack.i.h.bf16 %v4857_v4  ;;  %v4858_v8 = vunpack.i.l.bf16 %v4857_v4  ;;  %4178 = vmatmul.mubr.msk.f32.vlgmr.msra.gmra.mrb[16].mxu1 %vm439_vm0, %v4174_v37  ;;  %2336 = vmatprep.mubr.f32.mxu0 %v5033_v1  ;;  %v4193_v37 = vld [vmem:[%s5886_s3 + $0x88] sm:$0xff]  ;;  %v2955_v4 = vld [vmem:[%s5888_s5 + $0x138] sm:$0xff] }
 0x251   : > { %4458 = vmatpush1.bf16.msra.mxu1 %v4457_v2  ;;  %4460 = vmatprep.subr.bf16.mxu0 %v4459_v5  ;;  %v2939_v2 = vld [vmem:[%s5888_s5 + $0xb8] sm:$0xff]  ;;  %v4485_v5 = vpack.c.bf16 %v2921_v62, %v2920_v61  ;;  %v2941_v11 = vld [vmem:[%s5888_s5 + $0xc8] sm:$0xff] }
 0x252   : > { %v4463_v12 = vpack.c.bf16 %v4859_v7, %v4858_v8  ;;  %2211 = vmatprep.mubr.f32.mxu1 %v5033_v1  ;;  %4462 = vmatpush1.bf16.msra.mxu0 %v4461_v3  ;;  %v2450_v17 = vsel %vm2447_vm4, %v4834_v50, %v4858_v8  ;;  %v2453_v18 = vsel %vm2447_vm4, %v4844_v58, %v4859_v7  ;;  %v2954_v3 = vld [vmem:[%s5888_s5 + $0x130] sm:$0xff]  ;;  %v2923_v8 = vld [vmem:[%s5888_s5 + $0x38] sm:$0xff]  ;;  %v2957_v13 = vld [vmem:[%s5888_s5 + $0x148] sm:$0xff] }
 0x253   : > { %v4862_v16 = vpop.permute.xlu1 %4861  ;;  %4183 = vmatmul.mubr.msk.f32.gmra.mrb[10].mxu0 %vm439_vm0, %v4181_v9  ;;  %v4465_v15 = vpack.c.bf16 %v2453_v18, %v2450_v17  ;;  %v4481_v58 = vpack.c.bf16 %v2919_v53, %v2918_v52  ;;  %v4487_v6 = vpack.c.bf16 %v2939_v2, %v2938_v0  ;;  %v2922_v7 = vld [vmem:[%s5888_s5 + $0x30] sm:$0xff]  ;;  %v2924_v17 = vld [vmem:[%s5888_s5 + $0x40] sm:$0xff]  ;;  %v2925_v18 = vld [vmem:[%s5888_s5 + $0x48] sm:$0xff] }
 0x254   : > { %v4864_v19 = vunpack.i.h.bf16 %v4862_v16  ;;  %v4863_v20 = vunpack.i.l.bf16 %v4862_v16  ;;  %4179 = vmatmul.mubr.msk.f32.gmra.mrb[18].mxu1 %vm439_vm0, %v4175_v48  ;;  %4464 = vmatprep.subr.bf16.mxu1 %v4463_v12  ;;  %v2951_v48 = vld [vmem:[%s5888_s5 + $0x118] sm:$0xff]  ;;  %v2956_v12 = vld [vmem:[%s5888_s5 + $0x140] sm:$0xff]  ;;  %v2930_v53 = vld [vmem:[%s5888_s5 + $0x70] sm:$0xff] }
 0x255   : > { %2407 = vmatprep.mubr.f32.mxu1 %v5033_v1  ;;  %2532 = vmatprep.mubr.f32.mxu0 %v5033_v1  ;;  %v4511_v50 = vpack.c.bf16 %v2951_v48, %v2950_v47  ;;  %v2946_v48 = vld [vmem:[%s5888_s5 + $0xf0] sm:$0xff]  ;;  %v2967_v55 = vld [vmem:[%s5888_s5 + $0x198] sm:$0x3f]  ;;  %v2969_v0 = vld [vmem:[%s5887_s4 + $0x8] sm:$0xff] }
 0x256   : > { %v2653_v24 = vsel %vm2649_vm5, %v4869_v14, %v4863_v20  ;;  %v2654_v27 = vsel %vm2649_vm5, %v4863_v20, %v4864_v19  ;;  %v4489_v14 = vpack.c.bf16 %v2923_v8, %v2922_v7  ;;  %v2942_v20 = vld [vmem:[%s5888_s5 + $0xd0] sm:$0xff]  ;;  %v4503_v52 = vpack.c.bf16 %v2947_v49, %v2946_v48 }
 0x257   : > { %v4469_v23 = vpack.c.bf16 %v2653_v24, %v2650_v22  ;;  %v4872_v26 = vpop.permute.xlu1 %4871  ;;  %v4467_v28 = vpack.c.bf16 %v2654_v27, %v2651_v25  ;;  %4188 = vmatmul.mubr.msk.f32.vlgmr.msra.gmra.mrb[8].mxu0 %vm439_vm0, %v4186_v21  ;;  %v2958_v22 = vld [vmem:[%s5888_s5 + $0x150] sm:$0xff]  ;;  %v2959_v24 = vld [vmem:[%s5888_s5 + $0x158] sm:$0xff]  ;;  %v4493_v25 = vpack.c.bf16 %v2925_v18, %v2924_v17 }
 0x258   : > { %v4874_v29 = vunpack.i.h.bf16 %v4872_v26  ;;  %v4873_v30 = vunpack.i.l.bf16 %v4872_v26  ;;  %4184 = vmatmul.mubr.msk.f32.vlgmr.msra.gmra.mrb[16].mxu1 %vm439_vm0, %v4180_v60  ;;  %2538 = vmatprep.mubr.f32.mxu0 %v5033_v1  ;;  %v4483_v60 = vpack.c.bf16 %v2937_v59, %v2936_v57  ;;  %v2961_v26 = vld [vmem:[%s5888_s5 + $0x168] sm:$0xff] }
 0x259   : > { %4466 = vmatpush1.bf16.msra.mxu1 %v4465_v15  ;;  %4468 = vmatprep.subr.bf16.mxu0 %v4467_v28  ;;  %v4523_v15 = vpack.c.bf16 %v2959_v24, %v2958_v22 }
 0x25a   : > { %v4471_v32 = vpack.c.bf16 %v4874_v29, %v4873_v30  ;;  %2413 = vmatprep.mubr.f32.mxu1 %v5033_v1  ;;  %4470 = vmatpush1.bf16.msra.mxu0 %v4469_v23  ;;  %v2652_v33 = vsel %vm2649_vm5, %v4854_v10, %v4873_v30  ;;  %v2655_v34 = vsel %vm2649_vm5, %v4864_v19, %v4874_v29  ;;  %v2940_v10 = vld [vmem:[%s5888_s5 + $0xc0] sm:$0xff]  ;;  %v2962_v29 = vld [vmem:[%s5888_s5 + $0x170] sm:$0xff]  ;;  %v2963_v30 = vld [vmem:[%s5888_s5 + $0x178] sm:$0xff] }
 0x25b   : > { %4189 = vmatmul.mubr.msk.f32.gmra.mrb[10].mxu0 %vm439_vm0, %v4187_v31  ;;  %v4473_v36 = vpack.c.bf16 %v2655_v34, %v2652_v33  ;;  %v4491_v16 = vpack.c.bf16 %v2941_v11, %v2940_v10  ;;  %v4520_v19 = vpack.c.bf16 %v2957_v13, %v2956_v12  ;;  %v2960_v23 = vld [vmem:[%s5888_s5 + $0x160] sm:$0xff]  ;;  %v4529_v33 = vpack.c.bf16 %v2963_v30, %v2962_v29 }
 0x25c   : > { %4185 = vmatmul.mubr.msk.f32.gmra.mrb[18].mxu1 %vm439_vm0, %v4181_v9  ;;  %4472 = vmatprep.subr.bf16.mxu1 %v4471_v32  ;;  %v4517_v9 = vpack.c.bf16 %v2955_v4, %v2954_v3  ;;  %v4526_v28 = vpack.c.bf16 %v2961_v26, %v2960_v23  ;;  %v2927_v32 = vld [vmem:[%s5888_s5 + $0x58] sm:$0xff] }
 0x25d   : > { %2609 = vmatprep.mubr.f32.mxu1 %v5033_v1  ;;  %2734 = vmatprep.mubr.f32.mxu0 %v5033_v1 }
 0x25f   : > { %4194 = vmatmul.mubr.msk.f32.vlgmr.msra.gmra.mrb[8].mxu0 %vm439_vm0, %v4192_v35 }
 0x260   : > { %4190 = vmatmul.mubr.msk.f32.vlgmr.msra.gmra.mrb[16].mxu1 %vm439_vm0, %v4186_v21  ;;  %2740 = vmatprep.mubr.f32.mxu0 %v5033_v1  ;;  %v2943_v21 = vld [vmem:[%s5888_s5 + $0xd8] sm:$0xff] }
 0x261   : > { %4474 = vmatpush1.bf16.msra.mxu1 %v4473_v36  ;;  %2615 = vmatprep.mubr.f32.mxu1 %v5033_v1  ;;  %v4495_v27 = vpack.c.bf16 %v2943_v21, %v2942_v20 }
 0x262   : > { %4507 = vmatprep.subr.bf16.mxu1 %v5044_v41 }
 0x263   : > { %4195 = vmatmul.mubr.msk.f32.gmra.mrb[10].mxu0 %vm439_vm0, %v4193_v37 }
 0x264   : > { %4191 = vmatmul.mubr.msk.f32.gmra.mrb[18].mxu1 %vm439_vm0, %v4187_v31  ;;  %v2926_v31 = vld [vmem:[%s5888_s5 + $0x50] sm:$0xff] }
 0x265   : > { %2811 = vmatprep.mubr.f32.mxu1 %v5033_v1  ;;  %v4497_v34 = vpack.c.bf16 %v2927_v32, %v2926_v31 }
 0x268   : > { %4196 = vmatmul.mubr.msk.f32.vlgmr.msra.gmra.mrb[16].mxu1 %vm439_vm0, %v4192_v35 }
 0x269   : > { %2817 = vmatprep.mubr.f32.mxu1 %v5033_v1  ;;  %v2933_v1 = vld [vmem:[%s5888_s5 + $0x88] sm:$0xff]  ;;  %4509 = vmatpush1.bf16.msra.mxu1 %v4508_v42  ;;  %v2928_v42 = vld [vmem:[%s5888_s5 + $0x60] sm:$0xff] }
 0x26a   : > { %v4475_v45 = vpack.c.bf16 %v2933_v1, %v2932_v40  ;;  %4510 = vmatprep.subr.bf16.mxu1 %v5044_v41  ;;  %v2929_v1 = vld [vmem:[%s5888_s5 + $0x68] sm:$0xff] }
 0x26b   : > { %v4501_v44 = vpack.c.bf16 %v2929_v1, %v2928_v42 }
 0x26c   : > { %4197 = vmatmul.mubr.msk.f32.gmra.mrb[18].mxu1 %vm439_vm0, %v4193_v37  ;;  %4476 = vmatprep.subr.bf16.mxu0 %v4475_v45  ;;  %v2944_v37 = vld [vmem:[%s5888_s5 + $0xe0] sm:$0xff]  ;;  %v4532_v45 = vpack.c.bf16 %v2965_v43, %v2964_v39 }
 0x26d   : > { %4478 = vmatpush3.bf16.msra.mxu0 %v4477_v46  ;;  %4512 = vmatpush1.bf16.msra.mxu1 %v4511_v50  ;;  %v4499_v40 = vpack.c.bf16 %v2945_v38, %v2944_v37  ;;  %v2966_v50 = vld [vmem:[%s5888_s5 + $0x190] sm:$0xff] }
 0x26e   : > { %4480 = vmatprep.subr.bf16.mxu0 %v4479_v54  ;;  %4513 = vmatprep.subr.bf16.mxu1 %v5044_v41  ;;  %v2931_v54 = vld [vmem:[%s5888_s5 + $0x78] sm:$0xff]  ;;  %v4535_v57 = vpack.c.bf16 %v2967_v55, %v2966_v50 }
 0x26f   : > { %v4505_v56 = vpack.c.bf16 %v2931_v54, %v2930_v53 }
 0x271   : > { %4482 = vmatpush3.bf16.msra.mxu0 %v4481_v58  ;;  %4515 = vmatpush1.bf16.msra.mxu1 %v4514_v63  ;;  %v2968_v63 = vld [vmem:[%s5887_s4] sm:$0xff] }
 0x272   : > { %4484 = vmatprep.subr.bf16.mxu0 %v4483_v60  ;;  %4516 = vmatprep.subr.bf16.mxu1 %v5044_v41 }
 0x275   : > { %4486 = vmatpush3.bf16.msra.mxu0 %v4485_v5  ;;  %4518 = vmatpush1.bf16.msra.mxu1 %v4517_v9 }
 0x276   : > { %4488 = vmatprep.subr.bf16.mxu0 %v4487_v6  ;;  %4519 = vmatprep.subr.bf16.mxu1 %v5044_v41 }
 0x279   : > { %4490 = vmatpush3.bf16.msra.mxu0 %v4489_v14  ;;  %4521 = vmatpush1.bf16.msra.mxu1 %v4520_v19 }
 0x27a   : > { %4492 = vmatprep.subr.bf16.mxu0 %v4491_v16  ;;  %4522 = vmatprep.subr.bf16.mxu1 %v5044_v41 }
 0x27d   : > { %4494 = vmatpush3.bf16.msra.mxu0 %v4493_v25  ;;  %4524 = vmatpush1.bf16.msra.mxu1 %v4523_v15 }
 0x27e   : > { %4496 = vmatprep.subr.bf16.mxu0 %v4495_v27  ;;  %4525 = vmatprep.subr.bf16.mxu1 %v5044_v41 }
 0x281   : > { %4527 = vmatpush1.bf16.msra.mxu1 %v4526_v28  ;;  %4498 = vmatpush3.bf16.msra.mxu0 %v4497_v34 }
 0x282   : > { %4528 = vmatprep.subr.bf16.mxu1 %v5044_v41  ;;  %4500 = vmatprep.subr.bf16.mxu0 %v4499_v40 }
 0x285   : > { %4530 = vmatpush1.bf16.msra.mxu1 %v4529_v33  ;;  %4502 = vmatpush3.bf16.msra.mxu0 %v4501_v44 }
 0x286   : > { %4531 = vmatprep.subr.bf16.mxu1 %v5044_v41  ;;  %4504 = vmatprep.subr.bf16.mxu0 %v4503_v52  ;;  %v3167_v52 = vld [vmem:[%s5889_s6] sm:$0xff] }
 0x289   : > { %4533 = vmatpush1.bf16.msra.mxu1 %v4532_v45  ;;  %4506 = vmatpush3.bf16.msra.mxu0 %v4505_v56 }
 0x28a   : > { %4534 = vmatprep.subr.bf16.mxu1 %v5044_v41 }
 0x28d   : > { %4537 = vmatpush1.bf16.msk.msra.mxu1 %vm4536_vm8, %v4535_v57 }
 0x332   : > { %v5651_v35 = vpop.f32.mrb[8].mxu0 }
 0x333   : > { %v5653_v36 = vpop.f32.mrb[9].mxu0 }
 0x336   : > { %v5674_v46 = vpop.f32.mrb[10].mxu0 }
 0x337   : > { %v5676_v47 = vpop.f32.mrb[11].mxu0 }
 0x338   : > { %v4895_v51 = vpack.i.bf16 %v5676_v47, %v5651_v35 }
 0x33a   : > { %4891 = vrot.lane.b32.xlu1 %v4895_v51, %s5904_s18 }
 0x33b   : > { %v2813_v58 = vpop.f32.mrb[16].mxu1 }
 0x33c   : > { %v4880_v59 = vpack.i.bf16 %v2813_v58, %v5653_v36  ;;  %v2815_v60 = vpop.f32.mrb[17].mxu1 }
 0x33e   : > { %4876 = vrot.lane.b32.xlu0 %v4880_v59, %s5904_s18  ;;  %4896 = vrot.lane.b32.xlu1 %v4895_v51, %s5905_s19 }
 0x33f   : > { %v5703_v41 = vpop.f32.mrb[18].mxu1 }
 0x340   : > { %v4900_v61 = vpack.i.bf16 %v5674_v46, %v5703_v41  ;;  %v5707_v62 = vpop.f32.mrb[19].mxu1 }
 0x342   : > { %4881 = vrot.lane.b32.xlu0 %v4880_v59, %s5905_s19  ;;  %2846 = vrot.lane.b32.xlu1 %v2815_v60, %s5904_s18 }
 0x346   : > { %4886 = vrot.lane.b32.xlu0 %v4900_v61, %s5904_s18  ;;  %2884 = vrot.lane.b32.xlu1 %v2815_v60, %s5905_s19 }
 0x34a   : > { %4901 = vrot.lane.b32.xlu0 %v4900_v61, %s5905_s19  ;;  %2892 = vrot.lane.b32.xlu1 %v5707_v62, %s5905_s19  ;;  %s406_s19 = sand.u32 1, %s5023_s24  }
 0x34b   : > { %s407_s27 = scalar_lea.vmem [#allocation4], %s406_s19 }
 0x34e   : > { %2854 = vrot.lane.b32.xlu0 %v5707_v62, %s5904_s18  ;;  %2977 = vperm.xlu1 %4905, %v2969_v0   ;;  %s5052_s18 = smov 16  }
 0x352   : > { %2972 = vperm.xlu0 %4714, %v2968_v63  }
 0x3ac   : > { %v4892_v2 = vpop.permute.xlu1 %4891 }
 0x3ad   : > { %v4893_v7 = vunpack.i.l.bf16 %v4892_v2  ;;  %v4894_v22 = vunpack.i.h.bf16 %v4892_v2 }
 0x3b0   : > { %v4877_v3 = vpop.permute.xlu0 %4876  ;;  %v4897_v4 = vpop.permute.xlu1 %4896 }
 0x3b1   : > { %v4879_v5 = vunpack.i.h.bf16 %v4877_v3  ;;  %v4878_v6 = vunpack.i.l.bf16 %v4877_v3  ;;  %v4898_v14 = vunpack.i.l.bf16 %v4897_v4 }
 0x3b3   : > { %v2857_v8 = vsel %vm1083_vm13, %v4878_v6, %v4879_v5  ;;  %v2856_v9 = vsel %vm1083_vm13, %v4893_v7, %v4878_v6 }
 0x3b4   : > { %v4882_v10 = vpop.permute.xlu0 %4881  ;;  %v2847_v11 = vpop.permute.xlu1 %2846  ;;  %v2870_v17 = vmax.f32 %v5651_v35, %v2856_v9  ;;  %v2871_v18 = vmax.f32 %v5653_v36, %v2857_v8  ;;  %v4899_v35 = vunpack.i.h.bf16 %v4897_v4 }
 0x3b5   : > { %v4884_v12 = vunpack.i.h.bf16 %v4882_v10  ;;  %v4883_v13 = vunpack.i.l.bf16 %v4882_v10  ;;  %v2858_v16 = vsel %vm1083_vm13, %v4879_v5, %v2847_v11  ;;  %v2873_v21 = vmax.f32 %v2815_v60, %v2847_v11 }
 0x3b6   : > { %v2872_v15 = vmax.f32 %v2813_v58, %v2858_v16 }
 0x3b7   : > { %v2894_v19 = vsel %vm1437_vm14, %v4898_v14, %v4883_v13  ;;  %v2895_v20 = vsel %vm1437_vm14, %v4883_v13, %v4884_v12 }
 0x3b8   : > { %v2908_v24 = vmax.f32 %v2870_v17, %v2894_v19  ;;  %v4887_v25 = vpop.permute.xlu0 %4886  ;;  %v2909_v27 = vmax.f32 %v2871_v18, %v2895_v20  ;;  %v2885_v23 = vpop.permute.xlu1 %2884  ;;  %v3168_v18 = vld [vmem:[%s5889_s6 + $0x8] sm:$0xff]  ;;  %v4205_v19 = vld [vmem:[%s5889_s6 + $0x10] sm:$0xff]  ;;  %v3153_v20 = vld [vmem:[%s5890_s7] sm:$0xff] }
 0x3b9   : > { %v4889_v26 = vunpack.i.h.bf16 %v4887_v25  ;;  %v4888_v28 = vunpack.i.l.bf16 %v4887_v25  ;;  %v2896_v29 = vsel %vm1437_vm14, %v4884_v12, %v2885_v23  ;;  %v2911_v30 = vmax.f32 %v2873_v21, %v2885_v23  ;;  %v3912_v21 = vld [vmem:[%s5892_s9] sm:$0xff]  ;;  %v3913_v25 = vld [vmem:[%s5892_s9 + $0x8] sm:$0xff] }
 0x3ba   : > { %3055 = vmatprep.mubr.f32.mxu0 %v2909_v27  ;;  %v2910_v31 = vmax.f32 %v2872_v15, %v2896_v29  ;;  %v4040_v27 = vld [vmem:[#allocation3] sm:$0x1]  ;;  %v4018_v15 = vld [vmem:[%s5893_s10 + $0x8] sm:$0xff] }
 0x3bb   : > { %v2859_v32 = vsel %vm1083_vm13, %v4889_v26, %v4894_v22  ;;  %v2860_v33 = vsel %vm1083_vm13, %v4894_v22, %v4888_v28  ;;  %3056 = vmatmul.mubr.f32.vlgmr.msra.gmra.mrb[12].mxu0 %v2908_v24  ;;  %4199 = vmatprep.mubr.msk.f32.mxu1 %vm2980_vm9, %v2911_v30  ;;  %v3154_v22 = vld [vmem:[%s5890_s7 + $0x8] sm:$0xff]  ;;  %v4017_v24 = vld [vmem:[%s5893_s10] sm:$0xff] }
 0x3bc   : > { %v4902_v34 = vpop.permute.xlu0 %4901  ;;  %3131 = vmatmul.mubr.f32.vlgmr.msra.gmra.mrb[20].mxu1 %v2910_v31  ;;  %v2875_v38 = vmax.f32 %v5676_v47, %v2860_v33  ;;  %v2874_v39 = vmax.f32 %v5674_v46, %v2859_v32  ;;  %v2893_v50 = vpop.permute.xlu1 %2892 }
 0x3bd   : > { %v4904_v36 = vunpack.i.h.bf16 %v4902_v34  ;;  %v4903_v37 = vunpack.i.l.bf16 %v4902_v34 }
 0x3bf   : > { %v2898_v40 = vsel %vm1437_vm14, %v4899_v35, %v4903_v37  ;;  %v2897_v42 = vsel %vm1437_vm14, %v4904_v36, %v4899_v35  ;;  %v2899_v51 = vsel %vm1437_vm14, %v4903_v37, %v2893_v50  ;;  %v4206_v37 = vld [vmem:[%s5889_s6 + $0x18] sm:$0xff] }
 0x3c0   : > { %v2855_v1 = vpop.permute.xlu0 %2854  ;;  %v2913_v43 = vmax.f32 %v2875_v38, %v2898_v40  ;;  %v2912_v44 = vmax.f32 %v2874_v39, %v2897_v42  ;;  %v4209_v38 = vld [vmem:[%s5889_s6 + $0x20] sm:$0xff] }
 0x3c1   : > { %v2861_v45 = vsel %vm1083_vm13, %v4888_v28, %v2855_v1  ;;  %v2877_v48 = vmax.f32 %v5707_v62, %v2855_v1 }
 0x3c2   : > { %v2876_v49 = vmax.f32 %v5703_v41, %v2861_v45  ;;  %3060 = vmatprep.mubr.f32.mxu0 %v2913_v43  ;;  %v4210_v43 = vld [vmem:[%s5889_s6 + $0x28] sm:$0xff] }
 0x3c3   : > { %v2915_v47 = vmax.f32 %v2877_v48, %v2893_v50  ;;  %3061 = vmatmul.mubr.f32.gmra.mrb[14].mxu0 %v2912_v44  ;;  %v4213_v44 = vld [vmem:[%s5889_s6 + $0x30] sm:$0xff] }
 0x3c4   : > { %v2914_v46 = vmax.f32 %v2876_v49, %v2899_v51  ;;  %4320 = vmatprep.mubr.msk.f32.mxu0 %vm439_vm0, %v3167_v52  ;;  %v4214_v51 = vld [vmem:[%s5889_s6 + $0x38] sm:$0xff] }
 0x3c5   : > { %4200 = vmatprep.mubr.msk.f32.mxu1 %vm2980_vm9, %v2915_v47  ;;  %v4217_v47 = vld [vmem:[%s5889_s6 + $0x40] sm:$0xff] }
 0x3c6   : > { %3136 = vmatmul.mubr.f32.gmra.mrb[22].mxu1 %v2914_v46 }
 0x3cd   : > { %v2978_v63 = vpop.permute.xlu1 %2977 }
 0x3d1   : > { %v2973_v58 = vpop.permute.xlu0 %2972 }
 0x48e   : > { %v4274_v53 = vpop.f32.mrb[12].mxu0 }
 0x48f   : > { %v4275_v54 = vpop.f32.mrb[13].mxu0  ;;  %v3132_v55 = vpop.f32.mrb[20].mxu1 }
 0x490   : > { %v4276_v56 = vadd.f32 %v4275_v54, %v4274_v53  ;;  %v3134_v57 = vpop.f32.mrb[21].mxu1 }
 0x492   : > { %v3058_v59 = vadd.f32 %v4276_v56, %v2973_v58  ;;  %v4221_v56 = vld [vmem:[%s5889_s6 + $0x50] sm:$0xff] }
 0x494   : > { %v3133_v60 = vadd.f32 %v3132_v55, %v3058_v59  ;;  %v4218_v55 = vld [vmem:[%s5889_s6 + $0x48] sm:$0xff] }
 0x496   : > { %v3143_v41 = vmin.f32 %v3133_v60, 0.0  ;;  %v4277_v61 = vpop.f32.mrb[14].mxu0  ;;  %vm3141_vm10 = vcmp.gt.f32.partialorder %v3133_v60, 0.0 }
 0x497   : > { %v4278_v62 = vpop.f32.mrb[15].mxu0 }
 0x498   : > { %v4279_v0 = vadd.f32 %v4278_v62, %v4277_v61  ;;  %v3145_v3 = vmul.f32 1.442695, %v3143_v41  ;;  %v4222_v41 = vld [vmem:[%s5889_s6 + $0x58] sm:$0xff]  ;;  %v4225_v61 = vld [vmem:[%s5889_s6 + $0x60] sm:$0xff] }
 0x499   : > { %v3137_v2 = vpop.f32.mrb[22].mxu1 }
 0x49a   : > { %v3063_v4 = vadd.f32 %v4279_v0, %v2978_v63  ;;  %v3139_v5 = vpop.f32.mrb[23].mxu1  ;;  %4957 = vpow2.f32 %v3145_v3  ;;  %v4226_v63 = vld [vmem:[%s5889_s6 + $0x68] sm:$0xff]  ;;  %v4229_v0 = vld [vmem:[%s5889_s6 + $0x70] sm:$0xff]  ;;  %v3910_v3 = vld [vmem:[%s5891_s8] sm:$0xff] }
 0x49b   : > { %4376 = vmatprep.mubr.msk.f32.mxu1 %vm439_vm0, %v3910_v3 }
 0x49c   : > { %v3138_v6 = vadd.f32 %v3137_v2, %v3063_v4  ;;  %v4230_v2 = vld [vmem:[%s5889_s6 + $0x78] sm:$0xff] }
 0x49e   : > { %v3144_v7 = vmin.f32 %v3138_v6, 0.0  ;;  %vm3142_vm11 = vcmp.gt.f32.partialorder %v3138_v6, 0.0 }
 0x4a0   : > { %v3147_v8 = vmul.f32 1.442695, %v3144_v7 }
 0x4a2   : > { %4959 = vpow2.f32 %v3147_v8 }
 0x4a4   : > { %v4958_v9 = vpop.eup %4957 }
 0x4a5   : > { %v4201_v10 = vadd.f32 -1.0, %v4958_v9 }
 0x4a7   : > { %v3151_v13 = vsel %vm3141_vm10, %v3133_v60, %v4201_v10 }
 0x4ac   : > { %v4960_v11 = vpop.eup %4959 }
 0x4ad   : > { %v4202_v12 = vadd.f32 -1.0, %v4960_v11 }
 0x4af   : > { %v3152_v14 = vsel %vm3142_vm11, %v3138_v6, %v4202_v12 }
 0x4b0   : > { %v4911_v16 = vpack.i.bf16 %v3152_v14, %v3151_v13  ;;  %v4538_v17 = vpack.c.bf16 %v3152_v14, %v3151_v13 }
 0x4b2   : > { %4912 = vrot.lane.b32.xlu1 %v4911_v16, %s5046_s16  ;;  %4907 = vrot.lane.b32.xlu0 %v4911_v16, %s5047_s17  ;;  %s4054_s16 = scalar_lea.sflag [#allocation5], %s406_s19 }
 0x4b3   : > { %4539 = vmatprep.subr.bf16.mxu0 %v4538_v17 }
 0x4b4   : > { %4541 = vmatpush3.bf16.msra.mxu0 %v4538_v17 }
 0x4b6   : > { %4922 = vrot.lane.b32.xlu1 %v4911_v16, %s5048_s20  ;;  %4917 = vrot.lane.b32.xlu0 %v4911_v16, %s5049_s21  ;;  %s4066_s20 = sshll.u32 %s407_s27, 4  ;;  %s5843_s20 = int_to_ptr.vmem [resolvable:$true] %s4066_s20 }
 0x4b7   : > { %4321 = vmatmul.mubr.msk.f32.vlgmr.msra.gmra.mrb[16].mxu0 %vm439_vm0, %v3168_v18  ;;  %s4969_s17 = scalar_lea.vmem %s5843_s20, 16 }
 0x4b8   : > { %4327 = vmatprep.mubr.msk.f32.mxu0 %vm439_vm0, %v4205_v19  ;;  %p4970_p11 = scmp.ne.s32.totalorder %s5843_s20, %s4969_s17 }
 0x4ba   : > { %4932 = vrot.lane.b32.xlu1 %v4911_v16, %s5050_s29  ;;  %4927 = vrot.lane.b32.xlu0 %v4911_v16, %s5051_s30  ;;  %s5841_s30 = scalar_lea.hbm %s5895_s12, %s4239_s22  ;;  %p4971_p12 = pnand %p4970_p11, %p5160_p5 }
 0x4bc   : > { %p4972_p13 = pneg %p4971_p12 }
 0x4be   : > { %3157 = vperm.xlu1 %4905, %v3153_v20   ;;  %4937 = vrot.lane.b32.xlu0 %v4911_v16, %s5052_s18  ;;  %s4973_s18 = sshll.u32 %s5053_s11, 4  ;;  %s4974_s18 = int_to_ptr.vmem [resolvable:$false] %s4973_s18 }
 0x4bf   : > { %s4975_s0 = scalar_lea.vmem %s4974_s18, 32  ;;  %p4976_p0 = scmp.lt.s32.totalorder %s5843_s20, %s4974_s18 }
 0x4c0   : > { %p4977_p1 = scmp.lt.s32.totalorder %s4975_s0, %s4969_s17 }
 0x4c2   : > { %3916 = vperm.xlu1 %4905, %v3912_v21   ;;  %3162 = vperm.xlu0 %4714, %v3154_v22   ;;  %v3911_v22 = vld [vmem:[%s5891_s8 + $0x8] sm:$0xff]  ;;  %p4978_p2 = por %p4977_p1, %p4976_p0 }
 0x4c4   : > { %p4979_p3 = pnand %p4978_p2, %p4972_p13 }
 0x4c6   : > { %4021 = vperm.xlu1 %4905, %v4017_v24   ;;  %3921 = vperm.xlu0 %4714, %v3913_v25  }
 0x4ca   : > { %4043 = vperm.xlu1 %4905, %v4040_v27   ;;  %4026 = vperm.xlu0 %4714, %v4018_v15  }
 0x524   : > { %v4913_v23 = vpop.permute.xlu1 %4912  ;;  %v4908_v26 = vpop.permute.xlu0 %4907 }
 0x525   : > { %v4915_v28 = vunpack.i.h.bf16 %v4913_v23  ;;  %v4914_v29 = vunpack.i.l.bf16 %v4913_v23  ;;  %v4910_v30 = vunpack.i.h.bf16 %v4908_v26  ;;  %v4909_v31 = vunpack.i.l.bf16 %v4908_v26 }
 0x527   : > { %v4542_v32 = vpack.c.bf16 %v4910_v30, %v4909_v31  ;;  %v4546_v34 = vpack.c.bf16 %v4915_v28, %v4914_v29 }
 0x528   : > { %v4918_v33 = vpop.permute.xlu0 %4917  ;;  %v4923_v40 = vpop.permute.xlu1 %4922 }
 0x529   : > { %v4920_v35 = vunpack.i.h.bf16 %v4918_v33  ;;  %v4919_v36 = vunpack.i.l.bf16 %v4918_v33  ;;  %4543 = vmatprep.subr.bf16.mxu0 %v4542_v32  ;;  %v4925_v42 = vunpack.i.h.bf16 %v4923_v40  ;;  %v4924_v1 = vunpack.i.l.bf16 %v4923_v40 }
 0x52a   : > { %4545 = vmatpush3.bf16.msra.mxu0 %v4542_v32 }
 0x52b   : > { %4547 = vmatprep.subr.bf16.mxu0 %v4546_v34  ;;  %v4550_v39 = vpack.c.bf16 %v4920_v35, %v4919_v36  ;;  %v4554_v45 = vpack.c.bf16 %v4925_v42, %v4924_v1 }
 0x52c   : > { %v4928_v48 = vpop.permute.xlu0 %4927  ;;  %v4933_v52 = vpop.permute.xlu1 %4932 }
 0x52d   : > { %4328 = vmatmul.mubr.msk.f32.vlgmr.msra.gmra.mrb[16].mxu0 %vm439_vm0, %v4206_v37  ;;  %v4930_v49 = vunpack.i.h.bf16 %v4928_v48  ;;  %v4929_v50 = vunpack.i.l.bf16 %v4928_v48  ;;  %v4935_v53 = vunpack.i.h.bf16 %v4933_v52  ;;  %v4934_v54 = vunpack.i.l.bf16 %v4933_v52 }
 0x52e   : > { %4549 = vmatpush3.bf16.msra.mxu0 %v4546_v34  ;;  %4334 = vmatprep.mubr.msk.f32.mxu0 %vm439_vm0, %v4209_v38 }
 0x52f   : > { %4551 = vmatprep.subr.bf16.mxu0 %v4550_v39  ;;  %v4558_v46 = vpack.c.bf16 %v4930_v49, %v4929_v50  ;;  %v4562_v57 = vpack.c.bf16 %v4935_v53, %v4934_v54 }
 0x530   : > { %v4938_v58 = vpop.permute.xlu0 %4937 }
 0x531   : > { %v4940_v59 = vunpack.i.h.bf16 %v4938_v58  ;;  %v4939_v60 = vunpack.i.l.bf16 %v4938_v58 }
 0x533   : > { %v4566_v62 = vpack.c.bf16 %v4940_v59, %v4939_v60 }
 0x535   : > { %4335 = vmatmul.mubr.msk.f32.vlgmr.msra.gmra.mrb[16].mxu0 %vm439_vm0, %v4210_v43 }
 0x536   : > { %4553 = vmatpush3.bf16.msra.mxu0 %v4550_v39  ;;  %4341 = vmatprep.mubr.msk.f32.mxu0 %vm439_vm0, %v4213_v44  ;;  %v4046_v44 = vlaneseq }
 0x537   : > { %4555 = vmatprep.subr.bf16.mxu0 %v4554_v45 }
 0x538   : > { %v4047_v49 = vshrl.u32 %v4046_v44, 7 }
 0x53d   : > { %4342 = vmatmul.mubr.msk.f32.vlgmr.msra.gmra.mrb[16].mxu0 %vm439_vm0, %v4214_v51  ;;  %v3158_v6 = vpop.permute.xlu1 %3157 }
 0x53e   : > { %4557 = vmatpush3.bf16.msra.mxu0 %v4554_v45  ;;  %4348 = vmatprep.mubr.msk.f32.mxu0 %vm439_vm0, %v4217_v47  ;;  %v4048_v47 = vsub.s32 0, %v4047_v49 }
 0x53f   : > { %4559 = vmatprep.subr.bf16.mxu0 %v4558_v46 }
 0x541   : > { %v3163_v4 = vpop.permute.xlu0 %3162  ;;  %v3917_v27 = vpop.permute.xlu1 %3916 }
 0x545   : > { %4349 = vmatmul.mubr.msk.f32.vlgmr.msra.gmra.mrb[16].mxu0 %vm439_vm0, %v4218_v55  ;;  %v3922_v24 = vpop.permute.xlu0 %3921  ;;  %v4022_v38 = vpop.permute.xlu1 %4021 }
 0x546   : > { %4561 = vmatpush3.bf16.msra.mxu0 %v4558_v46  ;;  %4355 = vmatprep.mubr.msk.f32.mxu0 %vm439_vm0, %v4221_v56 }
 0x547   : > { %4563 = vmatprep.subr.bf16.mxu0 %v4562_v57 }
 0x549   : > { %v4027_v36 = vpop.permute.xlu0 %4026  ;;  %v4044_v52 = vpop.permute.xlu1 %4043 }
 0x54a   : > { %v4049_v54 = vrot.slane %v4044_v52, %v4048_v47 }
 0x54d   : > { %4356 = vmatmul.mubr.msk.f32.vlgmr.msra.gmra.mrb[16].mxu0 %vm439_vm0, %v4222_v41 }
 0x54e   : > { %4565 = vmatpush3.bf16.msra.mxu0 %v4562_v57  ;;  %4362 = vmatprep.mubr.msk.f32.mxu0 %vm439_vm0, %v4225_v61 }
 0x54f   : > { %4567 = vmatprep.subr.bf16.mxu0 %v4566_v62 }
 0x555   : > { %4363 = vmatmul.mubr.msk.f32.vlgmr.msra.gmra.mrb[16].mxu0 %vm439_vm0, %v4226_v63 }
 0x556   : > { %4569 = vmatpush3.bf16.msra.mxu0 %v4566_v62  ;;  %4369 = vmatprep.mubr.msk.f32.mxu0 %vm439_vm0, %v4229_v0 }
 0x55d   : > { %4370 = vmatmul.mubr.msk.f32.vlgmr.msra.gmra.mrb[16].mxu0 %vm439_vm0, %v4230_v2 }
 0x630   : > { %v4371_v5 = vpop.f32.mrb[16].mxu0 }
 0x631   : > { %v4574_v7 = vadd.f32 %v4371_v5, %v3163_v4  ;;  %v3887_v8 = vpop.f32.mrb[17].mxu0 }
 0x632   : > { %v4575_v9 = vadd.f32 %v3887_v8, %v3158_v6 }
 0x633   : > { %v3901_v10 = vmin.f32 %v4574_v7, 0.0  ;;  %vm3899_vm12 = vcmp.gt.f32.partialorder %v4574_v7, 0.0 }
 0x634   : > { %v3900_v11 = vmin.f32 %v4575_v9, 0.0  ;;  %vm3898_vm13 = vcmp.gt.f32.partialorder %v4575_v9, 0.0 }
 0x635   : > { %v3904_v12 = vmul.f32 1.442695, %v3901_v10 }
 0x636   : > { %v3902_v13 = vmul.f32 1.442695, %v3900_v11 }
 0x637   : > { %4961 = vpow2.f32 %v3904_v12 }
 0x638   : > { %4963 = vpow2.f32 %v3902_v13 }
 0x641   : > { %v4962_v14 = vpop.eup %4961 }
 0x642   : > { %v4964_v16 = vpop.eup %4963  ;;  %v4234_v17 = vadd.f32 -1.0, %v4962_v14 }
 0x643   : > { %v4233_v18 = vadd.f32 -1.0, %v4964_v16 }
 0x644   : > { %v3909_v19 = vsel %vm3899_vm12, %v4574_v7, %v4234_v17 }
 0x645   : > { %v3908_v20 = vsel %vm3898_vm13, %v4575_v9, %v4233_v18 }
 0x646   : > { %v4570_v21 = vpack.c.bf16 %v3909_v19, %v3908_v20 }
 0x648   : > { %4571 = vmatprep.subr.bf16.mxu1 %v4570_v21 }
 0x649   : > { %4573 = vmatpush3.bf16.msra.mxu1 %v4570_v21 }
 0x64c   : > { %4377 = vmatmul.mubr.msk.f32.vlgmr.msra.gmra.mrb[24].mxu1 %vm439_vm0, %v3911_v22 }
 0x71f   : > { %v4378_v25 = vpop.f32.mrb[24].mxu1 }
 0x720   : > { %v4002_v15 = vadd.f32 %v4378_v25, %v3922_v24  ;;  %v3996_v23 = vpop.f32.mrb[25].mxu1 }
 0x721   : > { %v3997_v26 = vadd.f32 %v3996_v23, %v3917_v27 }
 0x722   : > { %v4008_v28 = vmin.f32 %v4002_v15, 0.0  ;;  %vm4006_vm14 = vcmp.gt.f32.partialorder %v4002_v15, 0.0 }
 0x723   : > { %v4007_v29 = vmin.f32 %v3997_v26, 0.0  ;;  %vm4005_vm15 = vcmp.gt.f32.partialorder %v3997_v26, 0.0 }
 0x724   : > { %v4011_v30 = vmul.f32 1.442695, %v4008_v28 }
 0x725   : > { %v4009_v31 = vmul.f32 1.442695, %v4007_v29 }
 0x726   : > { %4965 = vpow2.f32 %v4011_v30 }
 0x727   : > { %4967 = vpow2.f32 %v4009_v31 }
 0x730   : > { %v4966_v32 = vpop.eup %4965 }
 0x731   : > { %v4968_v33 = vpop.eup %4967  ;;  %v4238_v34 = vadd.f32 -1.0, %v4966_v32 }
 0x732   : > { %v4237_v35 = vadd.f32 -1.0, %v4968_v33 }
 0x733   : > { %v4016_v37 = vsel %vm4006_vm14, %v4002_v15, %v4238_v34 }
 0x734   : > { %v4030_v39 = vmul.f32 %v4027_v36, %v4016_v37  ;;  %v4015_v40 = vsel %vm4005_vm15, %v3997_v26, %v4237_v35 }
 0x735   : > { %v4029_v42 = vmul.f32 %v4022_v38, %v4015_v40 }
 0x736   : > { %v4032_v1 = vsel %vm439_vm0, %v4030_v39, 0.0 }
 0x737   : > { %v4031_v43 = vsel %vm439_vm0, %v4029_v42, 0.0 }
 0x738   : > { %v4033_v45 = vadd.f32 %v4032_v1, %v4031_v43 }
 0x73a   : > { %v4034_v48 = vrot.slane %v4033_v45, 4 }
 0x73c   : > { %v4035_v50 = vadd.f32 %v4034_v48, %v4033_v45 }
 0x73e   : > { %v4036_v51 = vrot.slane %v4035_v50, 2 }
 0x740   : > { %v4037_v46 = vadd.f32 %v4036_v51, %v4035_v50 }
 0x742   : > { %v4038_v53 = vrot.slane %v4037_v46, 1 }
 0x744   : > { %v4039_v55 = vadd.f32 %v4038_v53, %v4037_v46 }
 0x746   : > { %v4050_v56 = vadd.f32 %v4049_v54, %v4039_v55 }
 0x748   : > { %4052 = vst.msk [vmem:[%s407_s27] sm:$0x1] %vm4051_vm1, %v4050_v56 }
 0x749   : > { %4982 = shalt.err (!%p4979_p3)
}
 0x74a   : > { %s4983_s19 = scalar_lea.hbm %s5841_s30, 16  ;;  %s4987_s21 = scalar_lea.hbm %s5895_s12, 32 }
 0x74b   : > { %p4984_p4 = scmp.ne.s32.totalorder %s5841_s30, %s4983_s19  ;;  %p4988_p9 = scmp.lt.u32.totalorder %s5841_s30, %s5895_s12 }
 0x74c   : > { %p4989_p10 = scmp.lt.u32.totalorder %s4987_s21, %s4983_s19  ;;  %p4991_p12 = scmp.lt.u32.totalorder %s4983_s19, %s5841_s30 }
 0x74d   : > { %p4985_p7 = pnand %p4984_p4, %p5160_p5 }
 0x74e   : > { %p4990_p11 = por %p4989_p10, %p4988_p9 }
 0x74f   : > { %p4986_p8 = pneg %p4985_p7 }
 0x750   : > { %p4992_p13 = por %p4991_p12, %p4990_p11 }
 0x752   : > { %p4993_p0 = pnand %p4992_p13, %p4986_p8 }
 0x754   : > { %4996 = shalt.err (!%p4993_p0)
}
 0x755   : > { %4655 = dma.vmem_to_hbm [thread:$0]  (%p5160_p5), %s5843_s20, 16, %s5841_s30, %s4054_s16  }
 0x756 PF: > { %p4661_p1 = scmp.ge.s32.totalorder %s5031_s26, 2  ;;  %s4078_s0 = sand.u32 1, %s5019_s23  }
 0x757   : > { %s4079_s17 = scalar_lea.sflag [#allocation5], %s4078_s0 }
 0x758   : > { %p4658_p2 = pnand %p4661_p1, %p5164_p6 }
 0x75a   : > { %5014 = dma.done.wait (!%p4658_p2), %s4079_s17, 16  }
 0x75b   : > { %5016 = vsyncadd (!%p4658_p2), %s4079_s17, 4294967280  ;;  %p24_p3 = scmp.ge.s32.totalorder %s5147_s28, 4   ;;  %s5906_s23 = smov %s5023_s24 }
 0x75c   : > { %s5907_s24 = smov %s5027_s25  ;;  %s5908_s25 = smov %s5158_s13 }
 0x75d   : > { %s5909_s26 = smov %s5147_s28  ;;  %26 = sbr.rel (!%p24_p3) target bundleno = 6 (0x6), region = 118 }
 0x764   :  { %4083 = vsyncpa [#allocation5], 1 }
 0x765   :  { %4085 = vsyncpa [#allocation5 + $0x1], 1 }

</bundles_post_ra>
